<compile_context>
chip_gen: v7x
topology: tpu7x:2x2x1
jax: 0.10.0
libtpu: 0.0.40
codegen_flags: <defaults>
</compile_context>

<pallas_src>
import functools
import math

import jax
import jax.numpy as jnp
from jax import lax
from jax.experimental import pallas as pl
from jax.experimental.pallas import tpu as pltpu

# ----------------------- small synthetic model config -----------------------
DIM = 64
N_LAYERS = 2
N_HEADS = 4
N_KV_HEADS = 2
VOCAB = 256
FFN_DIM = 128
NORM_EPS = 1e-5
ROPE_THETA = 500000.0
HEAD_DIM = DIM // N_HEADS            # 16
SEQ = 8                              # tokens (single sequence, prefill)
KV_PAD = SEQ                         # kv_padding
QKV_OUT = (N_HEADS + 2 * N_KV_HEADS) * HEAD_DIM   # 128
KV_D = N_KV_HEADS * HEAD_DIM                      # 32
GROUP = N_HEADS // N_KV_HEADS


# ------------------------------ fused kernel ---------------------------------
def _fused_forward_kernel(h_ref, cosq_ref, sinq_ref, cosk_ref, sink_ref,
                          wqkv_ref, wo_ref, w13_ref, w2_ref,
                          norms_ref, out_w_ref,
                          logits_ref, kv_ref,
                          *, n_layers, n_heads, n_kv_heads, head_dim,
                          ffn_dim, dim, eps):
    h = h_ref[...]                       # (T, DIM) activation, stays in vregs
    cos_q = cosq_ref[...]                # (H*T, head_dim)  (pre-scaled by 1/sqrt(hd))
    sin_q = sinq_ref[...]                # (H*T, head_dim)  signed (-sin | +sin), scaled
    cos_k = cosk_ref[...]                # (KV*T, head_dim)
    sin_k = sink_ref[...]                # (KV*T, head_dim) signed
    t = h.shape[0]
    group = n_heads // n_kv_heads
    qd = n_heads * head_dim
    kvd = n_kv_heads * head_dim
    hd2 = head_dim // 2

    def rmsnorm(x, w):                   # w: (1, features)
        var = jnp.mean(x * x, axis=-1, keepdims=True)
        return x * lax.rsqrt(var + eps) * w

    def bit_quant_matmul(x, w_bf16):     # w pre-transposed (K, N), bf16
        amax = jnp.maximum(jnp.max(jnp.abs(x), axis=-1, keepdims=True), 1e-5)
        xq = jnp.round(x * (127.0 / amax))          # already bounded in [-127, 127]
        y = jnp.dot(xq.astype(jnp.bfloat16), w_bf16,
                    preferred_element_type=jnp.float32)
        # fold per-row dequant (1/s == amax/127) into the matmul epilogue
        return y * (amax * (1.0 / 127.0))

    def rope_stacked(x, cos_s, sin_s):   # x: (N*T, hd) head-major stacked
        rot = jnp.concatenate([x[:, hd2:], x[:, :hd2]], axis=-1)
        return x * cos_s + rot * sin_s

    # Additive causal bias, built once (start_pos = 0 prefill), tiled over heads.
    qi = lax.broadcasted_iota(jnp.int32, (t, t), 0)
    ki = lax.broadcasted_iota(jnp.int32, (t, t), 1)
    bias = jnp.where(ki <= qi, 0.0, -1e30).astype(jnp.float32)          # (T, T)
    bias_all = jnp.concatenate([bias] * n_heads, axis=0)                # (H*T, T)

    kv_parts = []                        # lane-dense merged KV-cache output

    for l in range(n_layers):            # unrolled; all weights resident in VMEM
        nl = norms_ref[l]                # (8, FFN_DIM) packed norm weights
        attn_norm_w = nl[0:1, :dim]
        ffn_norm_w = nl[1:2, :dim]
        attn_sub_norm_w = nl[2:3, :dim]
        ffn_sub_norm_w = nl[3:4, :ffn_dim]

        # ------------------------- attention block -------------------------
        attn_in = rmsnorm(h, attn_norm_w)
        xqkv = bit_quant_matmul(attn_in, wqkv_ref[l])          # (T, QKV_OUT)
        xv_flat = xqkv[:, qd + kvd:]                           # (T, KV*hd)

        # Stack heads along the sublane axis (head-major rows).
        q_stacked = jnp.concatenate(
            [xqkv[:, hh * head_dim:(hh + 1) * head_dim] for hh in range(n_heads)],
            axis=0)                                            # (H*T, hd)
        k_stacked = jnp.concatenate(
            [xqkv[:, qd + g * head_dim: qd + (g + 1) * head_dim]
             for g in range(n_kv_heads)], axis=0)              # (KV*T, hd)
        v_stacked = jnp.concatenate(
            [xv_flat[:, g * head_dim:(g + 1) * head_dim]
             for g in range(n_kv_heads)], axis=0)              # (KV*T, hd)

        # Vectorized RoPE over all heads at once (scale folded into q tables).
        q_stacked = rope_stacked(q_stacked, cos_q, sin_q)
        k_stacked = rope_stacked(k_stacked, cos_k, sin_k)

        # KV-cache (rotated K, raw V) in original flat per-layer layout.
        xk_flat = jnp.concatenate(
            [k_stacked[g * t:(g + 1) * t, :] for g in range(n_kv_heads)], axis=-1)
        kv_parts.append(xk_flat)                               # (T, KV*hd)
        kv_parts.append(xv_flat)                               # (T, KV*hd)

        # Batched GQA: one score matmul + one PV matmul per KV head,
        # single softmax over the stacked (H*T, T) scores.
        score_parts = []
        for g in range(n_kv_heads):
            q_g = q_stacked[g * group * t:(g + 1) * group * t, :]   # (group*T, hd)
            k_g = k_stacked[g * t:(g + 1) * t, :]                   # (T, hd)
            score_parts.append(
                lax.dot_general(q_g, k_g, (((1,), (1,)), ((), ())),
                                preferred_element_type=jnp.float32))
        s_all = jnp.concatenate(score_parts, axis=0) + bias_all      # (H*T, T)
        m = jnp.max(s_all, axis=-1, keepdims=True)
        p = jnp.exp(s_all - m)
        denom = jnp.sum(p, axis=-1, keepdims=True)
        p = p * pl.reciprocal(denom, approx=True)

        pv_parts = []
        for g in range(n_kv_heads):
            p_g = p[g * group * t:(g + 1) * group * t, :]            # (group*T, T)
            v_g = v_stacked[g * t:(g + 1) * t, :]                    # (T, hd)
            pv_parts.append(jnp.dot(p_g, v_g,
                                    preferred_element_type=jnp.float32))
        pv_stacked = jnp.concatenate(pv_parts, axis=0)               # (H*T, hd)

        attn_out = jnp.concatenate(
            [pv_stacked[hh * t:(hh + 1) * t, :] for hh in range(n_heads)],
            axis=-1)                                                 # (T, H*hd)
        attn_out = rmsnorm(attn_out, attn_sub_norm_w)
        h = h + bit_quant_matmul(attn_out, wo_ref[l])

        # ------------------------ feed-forward block ------------------------
        ffn_in = rmsnorm(h, ffn_norm_w)
        x13 = bit_quant_matmul(ffn_in, w13_ref[l])                   # (T, 2*FFN)
        x1 = x13[:, :ffn_dim]
        x3 = x13[:, ffn_dim:]
        r = jnp.maximum(x1, 0.0)
        inner = rmsnorm((r * r) * x3, ffn_sub_norm_w)
        h = h + bit_quant_matmul(inner, w2_ref[l])

    h = rmsnorm(h, norms_ref[n_layers][0:1, :dim])
    logits_ref[...] = jnp.dot(h, out_w_ref[...],
                              preferred_element_type=jnp.float32)
    # Single lane-dense (T, L*2*KV_D) = (8, 128) cache store (unmasked vst).
    kv_ref[...] = jnp.concatenate(kv_parts, axis=-1)


# ------------------------------ wrapper / glue --------------------------------
def pack_params(params):
    """One-time repack: stack over layers, pre-transpose to (K,N), bf16 weights,
    and pack all norm vectors into a single (L+1, 8, FFN_DIM) array."""
    layers = params["layers"]
    n_layers = len(layers)
    norms = jnp.zeros((n_layers + 1, 8, FFN_DIM), jnp.float32)
    for l, lp in enumerate(layers):
        norms = norms.at[l, 0, :DIM].set(lp["attention_norm"][0])
        norms = norms.at[l, 1, :DIM].set(lp["ffn_norm"][0])
        norms = norms.at[l, 2, :DIM].set(lp["attn_sub_norm"][0])
        norms = norms.at[l, 3, :FFN_DIM].set(lp["ffn_sub_norm"][0])
    norms = norms.at[n_layers, 0, :DIM].set(params["norm"][0])
    return {
        "tok_embeddings": params["tok_embeddings"],
        "wqkv": jnp.stack([lp["wqkv"].T for lp in layers]).astype(jnp.bfloat16),
        "wo": jnp.stack([lp["wo"].T for lp in layers]).astype(jnp.bfloat16),
        "w13": jnp.stack([lp["w13"].T for lp in layers]).astype(jnp.bfloat16),
        "w2": jnp.stack([lp["w2"].T for lp in layers]).astype(jnp.bfloat16),
        "norms": norms,                                               # (L+1,8,FFN)
        "out_w": params["output"].T,                                  # (DIM, VOCAB)
    }


@jax.jit
def transformer_forward(packed, token_values, start_pos):
    t = token_values.shape[0]
    h0 = jnp.take(packed["tok_embeddings"], token_values, axis=0)     # (T, DIM)

    # Host-precomputed RoPE tables, expanded for the head-major stacked layout.
    positions = (start_pos + jnp.arange(t, dtype=jnp.int32)).astype(jnp.float32)
    inv_freq = 1.0 / (ROPE_THETA ** (
        jnp.arange(0, HEAD_DIM // 2, dtype=jnp.float32) * 2.0 / HEAD_DIM))
    ang = positions[:, None] * inv_freq[None, :]                      # (T, hd/2)
    cos = jnp.cos(ang)
    sin = jnp.sin(ang)
    cos_full = jnp.concatenate([cos, cos], axis=-1)                   # (T, hd)
    sin_signed = jnp.concatenate([-sin, sin], axis=-1)                # (T, hd)
    scale = 1.0 / math.sqrt(HEAD_DIM)
    cos_q = jnp.tile(cos_full, (N_HEADS, 1)) * scale                  # (H*T, hd)
    sin_q = jnp.tile(sin_signed, (N_HEADS, 1)) * scale
    cos_k = jnp.tile(cos_full, (N_KV_HEADS, 1))                       # (KV*T, hd)
    sin_k = jnp.tile(sin_signed, (N_KV_HEADS, 1))

    def spec(shape):
        nd = len(shape)
        return pl.BlockSpec(shape, lambda i, _nd=nd: (0,) * _nd)

    kernel = functools.partial(
        _fused_forward_kernel,
        n_layers=N_LAYERS, n_heads=N_HEADS, n_kv_heads=N_KV_HEADS,
        head_dim=HEAD_DIM, ffn_dim=FFN_DIM, dim=DIM, eps=NORM_EPS)

    logits, kv = pl.pallas_call(
        kernel,
        out_shape=(jax.ShapeDtypeStruct((t, VOCAB), jnp.float32),
                   jax.ShapeDtypeStruct((t, N_LAYERS * 2 * KV_D), jnp.float32)),
        grid=(1,),
        in_specs=[
            spec((t, DIM)),                        # h0
            spec((N_HEADS * t, HEAD_DIM)),         # cos_q (scaled)
            spec((N_HEADS * t, HEAD_DIM)),         # sin_q (signed, scaled)
            spec((N_KV_HEADS * t, HEAD_DIM)),      # cos_k
            spec((N_KV_HEADS * t, HEAD_DIM)),      # sin_k
            spec((N_LAYERS, DIM, QKV_OUT)),        # wqkv (K,N) bf16
            spec((N_LAYERS, DIM, DIM)),            # wo   (K,N) bf16
            spec((N_LAYERS, DIM, 2 * FFN_DIM)),    # w13  (K,N) bf16
            spec((N_LAYERS, FFN_DIM, DIM)),        # w2   (K,N) bf16
            spec((N_LAYERS + 1, 8, FFN_DIM)),      # packed norm weights
            spec((DIM, VOCAB)),                    # output projection (K,N)
        ],
        out_specs=(spec((t, VOCAB)),
                   spec((t, N_LAYERS * 2 * KV_D))),
        compiler_params=pltpu.CompilerParams(
            dimension_semantics=("arbitrary",),
            vmem_limit_bytes=32 * 1024 * 1024),
    )(h0, cos_q, sin_q, cos_k, sin_k,
      packed["wqkv"], packed["wo"], packed["w13"], packed["w2"],
      packed["norms"], packed["out_w"])

    new_caches = []
    for l in range(N_LAYERS):
        base = l * 2 * KV_D
        ck = kv[:, base:base + KV_D].reshape(t, N_KV_HEADS, HEAD_DIM)
        cv = kv[:, base + KV_D:base + 2 * KV_D].reshape(t, N_KV_HEADS, HEAD_DIM)
        new_caches.append((ck, cv))
    return logits.astype(jnp.float32), new_caches


# ------------------------------ param init ------------------------------------
def init_params(key):
    def dense(key, n, k, scale=0.02):
        return scale * jax.random.normal(key, (n, k), dtype=jnp.float32)

    keys = jax.random.split(key, 2 + N_LAYERS)
    params = {
        "tok_embeddings": 0.02 * jax.random.normal(keys[0], (VOCAB, DIM),
                                                   dtype=jnp.float32),
        "output": dense(keys[1], VOCAB, DIM),
        "norm": jnp.ones((1, DIM), jnp.float32),
        "layers": [],
    }
    for i in range(N_LAYERS):
        lk = jax.random.split(keys[2 + i], 4)
        params["layers"].append({
            "wqkv": dense(lk[0], QKV_OUT, DIM),
            "wo": dense(lk[1], DIM, N_HEADS * HEAD_DIM),
            "w13": dense(lk[2], 2 * FFN_DIM, DIM),
            "w2": dense(lk[3], DIM, FFN_DIM),
            "attention_norm": jnp.ones((1, DIM), jnp.float32),
            "ffn_norm": jnp.ones((1, DIM), jnp.float32),
            "attn_sub_norm": jnp.ones((1, DIM), jnp.float32),
            "ffn_sub_norm": jnp.ones((1, FFN_DIM), jnp.float32),
        })
    return params


# ---------------------------------- main ---------------------------------------
if __name__ == "__main__":
    key = jax.random.PRNGKey(0)
    pkey, tkey = jax.random.split(key)
    params = init_params(pkey)
    packed = pack_params(params)

    token_values = jax.random.randint(tkey, (SEQ,), 0, VOCAB, dtype=jnp.int32)
    start_pos = jnp.int32(0)

    logits, new_caches = transformer_forward(packed, token_values, start_pos)
    logits = jax.block_until_ready(logits)
    assert logits.shape == (SEQ, VOCAB) and logits.dtype == jnp.float32
    assert bool(jnp.all(jnp.isfinite(logits)))
    assert new_caches[0][0].shape == (KV_PAD, N_KV_HEADS, HEAD_DIM)
    assert new_caches[0][1].shape == (KV_PAD, N_KV_HEADS, HEAD_DIM)
    print("KERNEL_OK")
</pallas_src>

<mosaic_0001>
module attributes {stable_mosaic.version = 11 : i64} {
  func.func @_fused_forward_kernel(%arg0: i32, %arg1: memref<8x64xf32, #tpu.memory_space<vmem>>, %arg2: memref<32x16xf32, #tpu.memory_space<vmem>>, %arg3: memref<32x16xf32, #tpu.memory_space<vmem>>, %arg4: memref<16x16xf32, #tpu.memory_space<vmem>>, %arg5: memref<16x16xf32, #tpu.memory_space<vmem>>, %arg6: memref<2x64x128xbf16, #tpu.memory_space<vmem>>, %arg7: memref<2x64x64xbf16, #tpu.memory_space<vmem>>, %arg8: memref<2x64x256xbf16, #tpu.memory_space<vmem>>, %arg9: memref<2x128x64xbf16, #tpu.memory_space<vmem>>, %arg10: memref<3x8x128xf32, #tpu.memory_space<vmem>>, %arg11: memref<64x256xf32, #tpu.memory_space<vmem>>, %arg12: memref<8x256xf32, #tpu.memory_space<vmem>>, %arg13: memref<8x128xf32, #tpu.memory_space<vmem>>) attributes {dimension_semantics = [#tpu.dimension_semantics<arbitrary>], iteration_bounds = array<i64: 1>, scalar_prefetch = 0 : i64, scratch_operands = 0 : i64, tpu.core_type = #tpu.core_type<tc>, window_params = [{pipeline_mode = #tpu.pipeline_mode<synchronous>, transform_indices = @transform_0, window_bounds = array<i64: 8, 64>}, {pipeline_mode = #tpu.pipeline_mode<synchronous>, transform_indices = @transform_1, window_bounds = array<i64: 32, 16>}, {pipeline_mode = #tpu.pipeline_mode<synchronous>, transform_indices = @transform_2, window_bounds = array<i64: 32, 16>}, {pipeline_mode = #tpu.pipeline_mode<synchronous>, transform_indices = @transform_3, window_bounds = array<i64: 16, 16>}, {pipeline_mode = #tpu.pipeline_mode<synchronous>, transform_indices = @transform_4, window_bounds = array<i64: 16, 16>}, {pipeline_mode = #tpu.pipeline_mode<synchronous>, transform_indices = @transform_5, window_bounds = array<i64: 2, 64, 128>}, {pipeline_mode = #tpu.pipeline_mode<synchronous>, transform_indices = @transform_6, window_bounds = array<i64: 2, 64, 64>}, {pipeline_mode = #tpu.pipeline_mode<synchronous>, transform_indices = @transform_7, window_bounds = array<i64: 2, 64, 256>}, {pipeline_mode = #tpu.pipeline_mode<synchronous>, transform_indices = @transform_8, window_bounds = array<i64: 2, 128, 64>}, {pipeline_mode = #tpu.pipeline_mode<synchronous>, transform_indices = @transform_9, window_bounds = array<i64: 3, 8, 128>}, {pipeline_mode = #tpu.pipeline_mode<synchronous>, transform_indices = @transform_10, window_bounds = array<i64: 64, 256>}, {pipeline_mode = #tpu.pipeline_mode<synchronous>, transform_indices = @transform_11, window_bounds = array<i64: 8, 256>}, {pipeline_mode = #tpu.pipeline_mode<synchronous>, transform_indices = @transform_12, window_bounds = array<i64: 8, 128>}]} {
    %c0 = arith.constant 0 : index
    %c0_0 = arith.constant 0 : index
    %0 = vector.load %arg1[%c0, %c0_0] : memref<8x64xf32, #tpu.memory_space<vmem>>, vector<8x64xf32>
    %c0_1 = arith.constant 0 : index
    %c0_2 = arith.constant 0 : index
    %1 = vector.load %arg2[%c0_1, %c0_2] : memref<32x16xf32, #tpu.memory_space<vmem>>, vector<32x16xf32>
    %c0_3 = arith.constant 0 : index
    %c0_4 = arith.constant 0 : index
    %2 = vector.load %arg3[%c0_3, %c0_4] : memref<32x16xf32, #tpu.memory_space<vmem>>, vector<32x16xf32>
    %c0_5 = arith.constant 0 : index
    %c0_6 = arith.constant 0 : index
    %3 = vector.load %arg4[%c0_5, %c0_6] : memref<16x16xf32, #tpu.memory_space<vmem>>, vector<16x16xf32>
    %c0_7 = arith.constant 0 : index
    %c0_8 = arith.constant 0 : index
    %4 = vector.load %arg5[%c0_7, %c0_8] : memref<16x16xf32, #tpu.memory_space<vmem>>, vector<16x16xf32>
    %5 = tpu.iota {dimensions = array<i32: 0>} : vector<8x8xi32>
    %6 = tpu.iota {dimensions = array<i32: 1>} : vector<8x8xi32>
    %7 = arith.cmpi sle, %6, %5 : vector<8x8xi32>
    %cst = arith.constant 0.000000e+00 : f32
    %cst_9 = arith.constant -1.000000e+30 : f32
    %8 = vector.broadcast %cst : f32 to vector<8x8xf32>
    %9 = vector.broadcast %cst_9 : f32 to vector<8x8xf32>
    %10 = arith.select %7, %8, %9 : vector<8x8xi1>, vector<8x8xf32>
    %11 = tpu.concatenate %10, %10, %10, %10 in 0 : vector<8x8xf32>, vector<8x8xf32>, vector<8x8xf32>, vector<8x8xf32> -> vector<32x8xf32>
    %c0_10 = arith.constant 0 : index
    %c0_11 = arith.constant 0 : index
    %c0_12 = arith.constant 0 : index
    %12 = vector.load %arg10[%c0_10, %c0_11, %c0_12] : memref<3x8x128xf32, #tpu.memory_space<vmem>>, vector<1x8x128xf32>
    %13 = vector.shape_cast %12 : vector<1x8x128xf32> to vector<8x128xf32>
    %14 = vector.extract_strided_slice %13 {offsets = [0, 0], sizes = [1, 64], strides = [1, 1]} : vector<8x128xf32> to vector<1x64xf32>
    %15 = vector.extract_strided_slice %13 {offsets = [1, 0], sizes = [1, 64], strides = [1, 1]} : vector<8x128xf32> to vector<1x64xf32>
    %16 = vector.extract_strided_slice %13 {offsets = [2, 0], sizes = [1, 64], strides = [1, 1]} : vector<8x128xf32> to vector<1x64xf32>
    %17 = vector.extract_strided_slice %13 {offsets = [3, 0], sizes = [1, 128], strides = [1, 1]} : vector<8x128xf32> to vector<1x128xf32>
    %18 = arith.mulf %0, %0 : vector<8x64xf32>
    %cst_13 = arith.constant dense<0.000000e+00> : vector<8xf32>
    %19 = vector.multi_reduction <add>, %18, %cst_13 [1] : vector<8x64xf32> to vector<8xf32>
    %20 = vector.shape_cast %19 : vector<8xf32> to vector<8x1xf32>
    %cst_14 = arith.constant 6.400000e+01 : f32
    %21 = vector.broadcast %cst_14 : f32 to vector<8x1xf32>
    %22 = arith.divf %20, %21 : vector<8x1xf32>
    %cst_15 = arith.constant 9.99999974E-6 : f32
    %23 = vector.broadcast %cst_15 : f32 to vector<8x1xf32>
    %24 = arith.addf %22, %23 : vector<8x1xf32>
    %25 = math.rsqrt %24 : vector<8x1xf32>
    %26 = vector.broadcast %25 : vector<8x1xf32> to vector<8x64xf32>
    %27 = arith.mulf %0, %26 : vector<8x64xf32>
    %28 = vector.broadcast %14 : vector<1x64xf32> to vector<8x64xf32>
    %29 = arith.mulf %27, %28 : vector<8x64xf32>
    %c0_16 = arith.constant 0 : index
    %c0_17 = arith.constant 0 : index
    %c0_18 = arith.constant 0 : index
    %30 = vector.load %arg6[%c0_16, %c0_17, %c0_18] : memref<2x64x128xbf16, #tpu.memory_space<vmem>>, vector<1x64x128xbf16>
    %31 = vector.shape_cast %30 : vector<1x64x128xbf16> to vector<64x128xbf16>
    %32 = math.absf %29 : vector<8x64xf32>
    %cst_19 = arith.constant dense<0xFF800000> : vector<8xf32>
    %33 = vector.multi_reduction <maximumf>, %32, %cst_19 [1] : vector<8x64xf32> to vector<8xf32>
    %34 = vector.shape_cast %33 : vector<8xf32> to vector<8x1xf32>
    %cst_20 = arith.constant 9.99999974E-6 : f32
    %35 = vector.broadcast %cst_20 : f32 to vector<8x1xf32>
    %36 = arith.maximumf %34, %35 : vector<8x1xf32>
    %cst_21 = arith.constant 1.270000e+02 : f32
    %37 = vector.broadcast %cst_21 : f32 to vector<8x1xf32>
    %38 = arith.divf %37, %36 : vector<8x1xf32>
    %39 = vector.broadcast %38 : vector<8x1xf32> to vector<8x64xf32>
    %40 = arith.mulf %29, %39 : vector<8x64xf32>
    %41 = math.roundeven %40 : vector<8x64xf32>
    %42 = arith.truncf %41 : vector<8x64xf32> to vector<8x64xbf16>
    %cst_22 = arith.constant dense<0.000000e+00> : vector<8x128xf32>
    %43 = tpu.matmul %42, %31, %cst_22 {dimension_numbers = #tpu.dot_dimension_numbers<[1], [0], [0], [1], [0, 0, 1, 1], [], []>} : vector<8x64xbf16>, vector<64x128xbf16>, vector<8x128xf32> -> vector<8x128xf32>
    %cst_23 = arith.constant 0.00787401571 : f32
    %44 = vector.broadcast %cst_23 : f32 to vector<8x1xf32>
    %45 = arith.mulf %36, %44 : vector<8x1xf32>
    %46 = vector.broadcast %45 : vector<8x1xf32> to vector<8x128xf32>
    %47 = arith.mulf %43, %46 : vector<8x128xf32>
    %48 = vector.extract_strided_slice %47 {offsets = [0, 96], sizes = [8, 32], strides = [1, 1]} : vector<8x128xf32> to vector<8x32xf32>
    %49 = vector.extract_strided_slice %47 {offsets = [0, 0], sizes = [8, 16], strides = [1, 1]} : vector<8x128xf32> to vector<8x16xf32>
    %50 = vector.extract_strided_slice %47 {offsets = [0, 16], sizes = [8, 16], strides = [1, 1]} : vector<8x128xf32> to vector<8x16xf32>
    %51 = vector.extract_strided_slice %47 {offsets = [0, 32], sizes = [8, 16], strides = [1, 1]} : vector<8x128xf32> to vector<8x16xf32>
    %52 = vector.extract_strided_slice %47 {offsets = [0, 48], sizes = [8, 16], strides = [1, 1]} : vector<8x128xf32> to vector<8x16xf32>
    %53 = tpu.concatenate %49, %50, %51, %52 in 0 : vector<8x16xf32>, vector<8x16xf32>, vector<8x16xf32>, vector<8x16xf32> -> vector<32x16xf32>
    %54 = vector.extract_strided_slice %47 {offsets = [0, 64], sizes = [8, 16], strides = [1, 1]} : vector<8x128xf32> to vector<8x16xf32>
    %55 = vector.extract_strided_slice %47 {offsets = [0, 80], sizes = [8, 16], strides = [1, 1]} : vector<8x128xf32> to vector<8x16xf32>
    %56 = tpu.concatenate %54, %55 in 0 : vector<8x16xf32>, vector<8x16xf32> -> vector<16x16xf32>
    %57 = vector.extract_strided_slice %48 {offsets = [0, 0], sizes = [8, 16], strides = [1, 1]} : vector<8x32xf32> to vector<8x16xf32>
    %58 = vector.extract_strided_slice %48 {offsets = [0, 16], sizes = [8, 16], strides = [1, 1]} : vector<8x32xf32> to vector<8x16xf32>
    %59 = tpu.concatenate %57, %58 in 0 : vector<8x16xf32>, vector<8x16xf32> -> vector<16x16xf32>
    %60 = vector.extract_strided_slice %53 {offsets = [0, 8], sizes = [32, 8], strides = [1, 1]} : vector<32x16xf32> to vector<32x8xf32>
    %61 = vector.extract_strided_slice %53 {offsets = [0, 0], sizes = [32, 8], strides = [1, 1]} : vector<32x16xf32> to vector<32x8xf32>
    %62 = tpu.concatenate %60, %61 in 1 : vector<32x8xf32>, vector<32x8xf32> -> vector<32x16xf32>
    %63 = arith.mulf %53, %1 : vector<32x16xf32>
    %64 = arith.mulf %62, %2 : vector<32x16xf32>
    %65 = arith.addf %63, %64 : vector<32x16xf32>
    %66 = vector.extract_strided_slice %56 {offsets = [0, 8], sizes = [16, 8], strides = [1, 1]} : vector<16x16xf32> to vector<16x8xf32>
    %67 = vector.extract_strided_slice %56 {offsets = [0, 0], sizes = [16, 8], strides = [1, 1]} : vector<16x16xf32> to vector<16x8xf32>
    %68 = tpu.concatenate %66, %67 in 1 : vector<16x8xf32>, vector<16x8xf32> -> vector<16x16xf32>
    %69 = arith.mulf %56, %3 : vector<16x16xf32>
    %70 = arith.mulf %68, %4 : vector<16x16xf32>
    %71 = arith.addf %69, %70 : vector<16x16xf32>
    %72 = vector.extract_strided_slice %71 {offsets = [0, 0], sizes = [8, 16], strides = [1, 1]} : vector<16x16xf32> to vector<8x16xf32>
    %73 = vector.extract_strided_slice %71 {offsets = [8, 0], sizes = [8, 16], strides = [1, 1]} : vector<16x16xf32> to vector<8x16xf32>
    %74 = tpu.concatenate %72, %73 in 1 : vector<8x16xf32>, vector<8x16xf32> -> vector<8x32xf32>
    %75 = vector.extract_strided_slice %65 {offsets = [0, 0], sizes = [16, 16], strides = [1, 1]} : vector<32x16xf32> to vector<16x16xf32>
    %76 = vector.extract_strided_slice %71 {offsets = [0, 0], sizes = [8, 16], strides = [1, 1]} : vector<16x16xf32> to vector<8x16xf32>
    %cst_24 = arith.constant dense<0.000000e+00> : vector<16x8xf32>
    %77 = tpu.matmul %75, %76, %cst_24 {dimension_numbers = #tpu.dot_dimension_numbers<[1], [1], [0], [0], [0, 0, 1, 0], [], []>} : vector<16x16xf32>, vector<8x16xf32>, vector<16x8xf32> -> vector<16x8xf32>
    %78 = vector.extract_strided_slice %65 {offsets = [16, 0], sizes = [16, 16], strides = [1, 1]} : vector<32x16xf32> to vector<16x16xf32>
    %79 = vector.extract_strided_slice %71 {offsets = [8, 0], sizes = [8, 16], strides = [1, 1]} : vector<16x16xf32> to vector<8x16xf32>
    %cst_25 = arith.constant dense<0.000000e+00> : vector<16x8xf32>
    %80 = tpu.matmul %78, %79, %cst_25 {dimension_numbers = #tpu.dot_dimension_numbers<[1], [1], [0], [0], [0, 0, 1, 0], [], []>} : vector<16x16xf32>, vector<8x16xf32>, vector<16x8xf32> -> vector<16x8xf32>
    %81 = tpu.concatenate %77, %80 in 0 : vector<16x8xf32>, vector<16x8xf32> -> vector<32x8xf32>
    %82 = arith.addf %81, %11 : vector<32x8xf32>
    %cst_26 = arith.constant dense<0xFF800000> : vector<32xf32>
    %83 = vector.multi_reduction <maximumf>, %82, %cst_26 [1] : vector<32x8xf32> to vector<32xf32>
    %84 = vector.shape_cast %83 : vector<32xf32> to vector<32x1xf32>
    %85 = vector.broadcast %84 : vector<32x1xf32> to vector<32x8xf32>
    %86 = arith.subf %82, %85 : vector<32x8xf32>
    %87 = math.exp %86 : vector<32x8xf32>
    %cst_27 = arith.constant dense<0.000000e+00> : vector<32xf32>
    %88 = vector.multi_reduction <add>, %87, %cst_27 [1] : vector<32x8xf32> to vector<32xf32>
    %89 = vector.shape_cast %88 : vector<32xf32> to vector<32x1xf32>
    %90 = tpu.reciprocal %89 {approx = true} : vector<32x1xf32> -> vector<32x1xf32>
    %91 = vector.broadcast %90 : vector<32x1xf32> to vector<32x8xf32>
    %92 = arith.mulf %87, %91 : vector<32x8xf32>
    %93 = vector.extract_strided_slice %92 {offsets = [0, 0], sizes = [16, 8], strides = [1, 1]} : vector<32x8xf32> to vector<16x8xf32>
    %94 = vector.extract_strided_slice %59 {offsets = [0, 0], sizes = [8, 16], strides = [1, 1]} : vector<16x16xf32> to vector<8x16xf32>
    %cst_28 = arith.constant dense<0.000000e+00> : vector<16x16xf32>
    %95 = tpu.matmul %93, %94, %cst_28 {dimension_numbers = #tpu.dot_dimension_numbers<[1], [0], [0], [1], [0, 0, 1, 1], [], []>} : vector<16x8xf32>, vector<8x16xf32>, vector<16x16xf32> -> vector<16x16xf32>
    %96 = vector.extract_strided_slice %92 {offsets = [16, 0], sizes = [16, 8], strides = [1, 1]} : vector<32x8xf32> to vector<16x8xf32>
    %97 = vector.extract_strided_slice %59 {offsets = [8, 0], sizes = [8, 16], strides = [1, 1]} : vector<16x16xf32> to vector<8x16xf32>
    %cst_29 = arith.constant dense<0.000000e+00> : vector<16x16xf32>
    %98 = tpu.matmul %96, %97, %cst_29 {dimension_numbers = #tpu.dot_dimension_numbers<[1], [0], [0], [1], [0, 0, 1, 1], [], []>} : vector<16x8xf32>, vector<8x16xf32>, vector<16x16xf32> -> vector<16x16xf32>
    %99 = tpu.concatenate %95, %98 in 0 : vector<16x16xf32>, vector<16x16xf32> -> vector<32x16xf32>
    %100 = vector.extract_strided_slice %99 {offsets = [0, 0], sizes = [8, 16], strides = [1, 1]} : vector<32x16xf32> to vector<8x16xf32>
    %101 = vector.extract_strided_slice %99 {offsets = [8, 0], sizes = [8, 16], strides = [1, 1]} : vector<32x16xf32> to vector<8x16xf32>
    %102 = vector.extract_strided_slice %99 {offsets = [16, 0], sizes = [8, 16], strides = [1, 1]} : vector<32x16xf32> to vector<8x16xf32>
    %103 = vector.extract_strided_slice %99 {offsets = [24, 0], sizes = [8, 16], strides = [1, 1]} : vector<32x16xf32> to vector<8x16xf32>
    %104 = tpu.concatenate %100, %101, %102, %103 in 1 : vector<8x16xf32>, vector<8x16xf32>, vector<8x16xf32>, vector<8x16xf32> -> vector<8x64xf32>
    %105 = arith.mulf %104, %104 : vector<8x64xf32>
    %cst_30 = arith.constant dense<0.000000e+00> : vector<8xf32>
    %106 = vector.multi_reduction <add>, %105, %cst_30 [1] : vector<8x64xf32> to vector<8xf32>
    %107 = vector.shape_cast %106 : vector<8xf32> to vector<8x1xf32>
    %cst_31 = arith.constant 6.400000e+01 : f32
    %108 = vector.broadcast %cst_31 : f32 to vector<8x1xf32>
    %109 = arith.divf %107, %108 : vector<8x1xf32>
    %cst_32 = arith.constant 9.99999974E-6 : f32
    %110 = vector.broadcast %cst_32 : f32 to vector<8x1xf32>
    %111 = arith.addf %109, %110 : vector<8x1xf32>
    %112 = math.rsqrt %111 : vector<8x1xf32>
    %113 = vector.broadcast %112 : vector<8x1xf32> to vector<8x64xf32>
    %114 = arith.mulf %104, %113 : vector<8x64xf32>
    %115 = vector.broadcast %16 : vector<1x64xf32> to vector<8x64xf32>
    %116 = arith.mulf %114, %115 : vector<8x64xf32>
    %c0_33 = arith.constant 0 : index
    %c0_34 = arith.constant 0 : index
    %c0_35 = arith.constant 0 : index
    %117 = vector.load %arg7[%c0_33, %c0_34, %c0_35] : memref<2x64x64xbf16, #tpu.memory_space<vmem>>, vector<1x64x64xbf16>
    %118 = vector.shape_cast %117 : vector<1x64x64xbf16> to vector<64x64xbf16>
    %119 = math.absf %116 : vector<8x64xf32>
    %cst_36 = arith.constant dense<0xFF800000> : vector<8xf32>
    %120 = vector.multi_reduction <maximumf>, %119, %cst_36 [1] : vector<8x64xf32> to vector<8xf32>
    %121 = vector.shape_cast %120 : vector<8xf32> to vector<8x1xf32>
    %cst_37 = arith.constant 9.99999974E-6 : f32
    %122 = vector.broadcast %cst_37 : f32 to vector<8x1xf32>
    %123 = arith.maximumf %121, %122 : vector<8x1xf32>
    %cst_38 = arith.constant 1.270000e+02 : f32
    %124 = vector.broadcast %cst_38 : f32 to vector<8x1xf32>
    %125 = arith.divf %124, %123 : vector<8x1xf32>
    %126 = vector.broadcast %125 : vector<8x1xf32> to vector<8x64xf32>
    %127 = arith.mulf %116, %126 : vector<8x64xf32>
    %128 = math.roundeven %127 : vector<8x64xf32>
    %129 = arith.truncf %128 : vector<8x64xf32> to vector<8x64xbf16>
    %cst_39 = arith.constant dense<0.000000e+00> : vector<8x64xf32>
    %130 = tpu.matmul %129, %118, %cst_39 {dimension_numbers = #tpu.dot_dimension_numbers<[1], [0], [0], [1], [0, 0, 1, 1], [], []>} : vector<8x64xbf16>, vector<64x64xbf16>, vector<8x64xf32> -> vector<8x64xf32>
    %cst_40 = arith.constant 0.00787401571 : f32
    %131 = vector.broadcast %cst_40 : f32 to vector<8x1xf32>
    %132 = arith.mulf %123, %131 : vector<8x1xf32>
    %133 = vector.broadcast %132 : vector<8x1xf32> to vector<8x64xf32>
    %134 = arith.mulf %130, %133 : vector<8x64xf32>
    %135 = arith.addf %0, %134 : vector<8x64xf32>
    %136 = arith.mulf %135, %135 : vector<8x64xf32>
    %cst_41 = arith.constant dense<0.000000e+00> : vector<8xf32>
    %137 = vector.multi_reduction <add>, %136, %cst_41 [1] : vector<8x64xf32> to vector<8xf32>
    %138 = vector.shape_cast %137 : vector<8xf32> to vector<8x1xf32>
    %cst_42 = arith.constant 6.400000e+01 : f32
    %139 = vector.broadcast %cst_42 : f32 to vector<8x1xf32>
    %140 = arith.divf %138, %139 : vector<8x1xf32>
    %cst_43 = arith.constant 9.99999974E-6 : f32
    %141 = vector.broadcast %cst_43 : f32 to vector<8x1xf32>
    %142 = arith.addf %140, %141 : vector<8x1xf32>
    %143 = math.rsqrt %142 : vector<8x1xf32>
    %144 = vector.broadcast %143 : vector<8x1xf32> to vector<8x64xf32>
    %145 = arith.mulf %135, %144 : vector<8x64xf32>
    %146 = vector.broadcast %15 : vector<1x64xf32> to vector<8x64xf32>
    %147 = arith.mulf %145, %146 : vector<8x64xf32>
    %c0_44 = arith.constant 0 : index
    %c0_45 = arith.constant 0 : index
    %c0_46 = arith.constant 0 : index
    %148 = vector.load %arg8[%c0_44, %c0_45, %c0_46] : memref<2x64x256xbf16, #tpu.memory_space<vmem>>, vector<1x64x256xbf16>
    %149 = vector.shape_cast %148 : vector<1x64x256xbf16> to vector<64x256xbf16>
    %150 = math.absf %147 : vector<8x64xf32>
    %cst_47 = arith.constant dense<0xFF800000> : vector<8xf32>
    %151 = vector.multi_reduction <maximumf>, %150, %cst_47 [1] : vector<8x64xf32> to vector<8xf32>
    %152 = vector.shape_cast %151 : vector<8xf32> to vector<8x1xf32>
    %cst_48 = arith.constant 9.99999974E-6 : f32
    %153 = vector.broadcast %cst_48 : f32 to vector<8x1xf32>
    %154 = arith.maximumf %152, %153 : vector<8x1xf32>
    %cst_49 = arith.constant 1.270000e+02 : f32
    %155 = vector.broadcast %cst_49 : f32 to vector<8x1xf32>
    %156 = arith.divf %155, %154 : vector<8x1xf32>
    %157 = vector.broadcast %156 : vector<8x1xf32> to vector<8x64xf32>
    %158 = arith.mulf %147, %157 : vector<8x64xf32>
    %159 = math.roundeven %158 : vector<8x64xf32>
    %160 = arith.truncf %159 : vector<8x64xf32> to vector<8x64xbf16>
    %cst_50 = arith.constant dense<0.000000e+00> : vector<8x256xf32>
    %161 = tpu.matmul %160, %149, %cst_50 {dimension_numbers = #tpu.dot_dimension_numbers<[1], [0], [0], [1], [0, 0, 1, 1], [], []>} : vector<8x64xbf16>, vector<64x256xbf16>, vector<8x256xf32> -> vector<8x256xf32>
    %cst_51 = arith.constant 0.00787401571 : f32
    %162 = vector.broadcast %cst_51 : f32 to vector<8x1xf32>
    %163 = arith.mulf %154, %162 : vector<8x1xf32>
    %164 = vector.broadcast %163 : vector<8x1xf32> to vector<8x256xf32>
    %165 = arith.mulf %161, %164 : vector<8x256xf32>
    %166 = vector.extract_strided_slice %165 {offsets = [0, 0], sizes = [8, 128], strides = [1, 1]} : vector<8x256xf32> to vector<8x128xf32>
    %167 = vector.extract_strided_slice %165 {offsets = [0, 128], sizes = [8, 128], strides = [1, 1]} : vector<8x256xf32> to vector<8x128xf32>
    %cst_52 = arith.constant 0.000000e+00 : f32
    %168 = vector.broadcast %cst_52 : f32 to vector<8x128xf32>
    %169 = arith.maximumf %166, %168 : vector<8x128xf32>
    %170 = arith.mulf %169, %169 : vector<8x128xf32>
    %171 = arith.mulf %170, %167 : vector<8x128xf32>
    %172 = arith.mulf %171, %171 : vector<8x128xf32>
    %cst_53 = arith.constant dense<0.000000e+00> : vector<8xf32>
    %173 = vector.multi_reduction <add>, %172, %cst_53 [1] : vector<8x128xf32> to vector<8xf32>
    %174 = vector.shape_cast %173 : vector<8xf32> to vector<8x1xf32>
    %cst_54 = arith.constant 1.280000e+02 : f32
    %175 = vector.broadcast %cst_54 : f32 to vector<8x1xf32>
    %176 = arith.divf %174, %175 : vector<8x1xf32>
    %cst_55 = arith.constant 9.99999974E-6 : f32
    %177 = vector.broadcast %cst_55 : f32 to vector<8x1xf32>
    %178 = arith.addf %176, %177 : vector<8x1xf32>
    %179 = math.rsqrt %178 : vector<8x1xf32>
    %180 = vector.broadcast %179 : vector<8x1xf32> to vector<8x128xf32>
    %181 = arith.mulf %171, %180 : vector<8x128xf32>
    %182 = vector.broadcast %17 : vector<1x128xf32> to vector<8x128xf32>
    %183 = arith.mulf %181, %182 : vector<8x128xf32>
    %c0_56 = arith.constant 0 : index
    %c0_57 = arith.constant 0 : index
    %c0_58 = arith.constant 0 : index
    %184 = vector.load %arg9[%c0_56, %c0_57, %c0_58] : memref<2x128x64xbf16, #tpu.memory_space<vmem>>, vector<1x128x64xbf16>
    %185 = vector.shape_cast %184 : vector<1x128x64xbf16> to vector<128x64xbf16>
    %186 = math.absf %183 : vector<8x128xf32>
    %cst_59 = arith.constant dense<0xFF800000> : vector<8xf32>
    %187 = vector.multi_reduction <maximumf>, %186, %cst_59 [1] : vector<8x128xf32> to vector<8xf32>
    %188 = vector.shape_cast %187 : vector<8xf32> to vector<8x1xf32>
    %cst_60 = arith.constant 9.99999974E-6 : f32
    %189 = vector.broadcast %cst_60 : f32 to vector<8x1xf32>
    %190 = arith.maximumf %188, %189 : vector<8x1xf32>
    %cst_61 = arith.constant 1.270000e+02 : f32
    %191 = vector.broadcast %cst_61 : f32 to vector<8x1xf32>
    %192 = arith.divf %191, %190 : vector<8x1xf32>
    %193 = vector.broadcast %192 : vector<8x1xf32> to vector<8x128xf32>
    %194 = arith.mulf %183, %193 : vector<8x128xf32>
    %195 = math.roundeven %194 : vector<8x128xf32>
    %196 = arith.truncf %195 : vector<8x128xf32> to vector<8x128xbf16>
    %cst_62 = arith.constant dense<0.000000e+00> : vector<8x64xf32>
    %197 = tpu.matmul %196, %185, %cst_62 {dimension_numbers = #tpu.dot_dimension_numbers<[1], [0], [0], [1], [0, 0, 1, 1], [], []>} : vector<8x128xbf16>, vector<128x64xbf16>, vector<8x64xf32> -> vector<8x64xf32>
    %cst_63 = arith.constant 0.00787401571 : f32
    %198 = vector.broadcast %cst_63 : f32 to vector<8x1xf32>
    %199 = arith.mulf %190, %198 : vector<8x1xf32>
    %200 = vector.broadcast %199 : vector<8x1xf32> to vector<8x64xf32>
    %201 = arith.mulf %197, %200 : vector<8x64xf32>
    %202 = arith.addf %135, %201 : vector<8x64xf32>
    %c1 = arith.constant 1 : index
    %c0_64 = arith.constant 0 : index
    %c0_65 = arith.constant 0 : index
    %203 = vector.load %arg10[%c1, %c0_64, %c0_65] : memref<3x8x128xf32, #tpu.memory_space<vmem>>, vector<1x8x128xf32>
    %204 = vector.shape_cast %203 : vector<1x8x128xf32> to vector<8x128xf32>
    %205 = vector.extract_strided_slice %204 {offsets = [0, 0], sizes = [1, 64], strides = [1, 1]} : vector<8x128xf32> to vector<1x64xf32>
    %206 = vector.extract_strided_slice %204 {offsets = [1, 0], sizes = [1, 64], strides = [1, 1]} : vector<8x128xf32> to vector<1x64xf32>
    %207 = vector.extract_strided_slice %204 {offsets = [2, 0], sizes = [1, 64], strides = [1, 1]} : vector<8x128xf32> to vector<1x64xf32>
    %208 = vector.extract_strided_slice %204 {offsets = [3, 0], sizes = [1, 128], strides = [1, 1]} : vector<8x128xf32> to vector<1x128xf32>
    %209 = arith.mulf %202, %202 : vector<8x64xf32>
    %cst_66 = arith.constant dense<0.000000e+00> : vector<8xf32>
    %210 = vector.multi_reduction <add>, %209, %cst_66 [1] : vector<8x64xf32> to vector<8xf32>
    %211 = vector.shape_cast %210 : vector<8xf32> to vector<8x1xf32>
    %cst_67 = arith.constant 6.400000e+01 : f32
    %212 = vector.broadcast %cst_67 : f32 to vector<8x1xf32>
    %213 = arith.divf %211, %212 : vector<8x1xf32>
    %cst_68 = arith.constant 9.99999974E-6 : f32
    %214 = vector.broadcast %cst_68 : f32 to vector<8x1xf32>
    %215 = arith.addf %213, %214 : vector<8x1xf32>
    %216 = math.rsqrt %215 : vector<8x1xf32>
    %217 = vector.broadcast %216 : vector<8x1xf32> to vector<8x64xf32>
    %218 = arith.mulf %202, %217 : vector<8x64xf32>
    %219 = vector.broadcast %205 : vector<1x64xf32> to vector<8x64xf32>
    %220 = arith.mulf %218, %219 : vector<8x64xf32>
    %c1_69 = arith.constant 1 : index
    %c0_70 = arith.constant 0 : index
    %c0_71 = arith.constant 0 : index
    %221 = vector.load %arg6[%c1_69, %c0_70, %c0_71] : memref<2x64x128xbf16, #tpu.memory_space<vmem>>, vector<1x64x128xbf16>
    %222 = vector.shape_cast %221 : vector<1x64x128xbf16> to vector<64x128xbf16>
    %223 = math.absf %220 : vector<8x64xf32>
    %cst_72 = arith.constant dense<0xFF800000> : vector<8xf32>
    %224 = vector.multi_reduction <maximumf>, %223, %cst_72 [1] : vector<8x64xf32> to vector<8xf32>
    %225 = vector.shape_cast %224 : vector<8xf32> to vector<8x1xf32>
    %cst_73 = arith.constant 9.99999974E-6 : f32
    %226 = vector.broadcast %cst_73 : f32 to vector<8x1xf32>
    %227 = arith.maximumf %225, %226 : vector<8x1xf32>
    %cst_74 = arith.constant 1.270000e+02 : f32
    %228 = vector.broadcast %cst_74 : f32 to vector<8x1xf32>
    %229 = arith.divf %228, %227 : vector<8x1xf32>
    %230 = vector.broadcast %229 : vector<8x1xf32> to vector<8x64xf32>
    %231 = arith.mulf %220, %230 : vector<8x64xf32>
    %232 = math.roundeven %231 : vector<8x64xf32>
    %233 = arith.truncf %232 : vector<8x64xf32> to vector<8x64xbf16>
    %cst_75 = arith.constant dense<0.000000e+00> : vector<8x128xf32>
    %234 = tpu.matmul %233, %222, %cst_75 {dimension_numbers = #tpu.dot_dimension_numbers<[1], [0], [0], [1], [0, 0, 1, 1], [], []>} : vector<8x64xbf16>, vector<64x128xbf16>, vector<8x128xf32> -> vector<8x128xf32>
    %cst_76 = arith.constant 0.00787401571 : f32
    %235 = vector.broadcast %cst_76 : f32 to vector<8x1xf32>
    %236 = arith.mulf %227, %235 : vector<8x1xf32>
    %237 = vector.broadcast %236 : vector<8x1xf32> to vector<8x128xf32>
    %238 = arith.mulf %234, %237 : vector<8x128xf32>
    %239 = vector.extract_strided_slice %238 {offsets = [0, 96], sizes = [8, 32], strides = [1, 1]} : vector<8x128xf32> to vector<8x32xf32>
    %240 = vector.extract_strided_slice %238 {offsets = [0, 0], sizes = [8, 16], strides = [1, 1]} : vector<8x128xf32> to vector<8x16xf32>
    %241 = vector.extract_strided_slice %238 {offsets = [0, 16], sizes = [8, 16], strides = [1, 1]} : vector<8x128xf32> to vector<8x16xf32>
    %242 = vector.extract_strided_slice %238 {offsets = [0, 32], sizes = [8, 16], strides = [1, 1]} : vector<8x128xf32> to vector<8x16xf32>
    %243 = vector.extract_strided_slice %238 {offsets = [0, 48], sizes = [8, 16], strides = [1, 1]} : vector<8x128xf32> to vector<8x16xf32>
    %244 = tpu.concatenate %240, %241, %242, %243 in 0 : vector<8x16xf32>, vector<8x16xf32>, vector<8x16xf32>, vector<8x16xf32> -> vector<32x16xf32>
    %245 = vector.extract_strided_slice %238 {offsets = [0, 64], sizes = [8, 16], strides = [1, 1]} : vector<8x128xf32> to vector<8x16xf32>
    %246 = vector.extract_strided_slice %238 {offsets = [0, 80], sizes = [8, 16], strides = [1, 1]} : vector<8x128xf32> to vector<8x16xf32>
    %247 = tpu.concatenate %245, %246 in 0 : vector<8x16xf32>, vector<8x16xf32> -> vector<16x16xf32>
    %248 = vector.extract_strided_slice %239 {offsets = [0, 0], sizes = [8, 16], strides = [1, 1]} : vector<8x32xf32> to vector<8x16xf32>
    %249 = vector.extract_strided_slice %239 {offsets = [0, 16], sizes = [8, 16], strides = [1, 1]} : vector<8x32xf32> to vector<8x16xf32>
    %250 = tpu.concatenate %248, %249 in 0 : vector<8x16xf32>, vector<8x16xf32> -> vector<16x16xf32>
    %251 = vector.extract_strided_slice %244 {offsets = [0, 8], sizes = [32, 8], strides = [1, 1]} : vector<32x16xf32> to vector<32x8xf32>
    %252 = vector.extract_strided_slice %244 {offsets = [0, 0], sizes = [32, 8], strides = [1, 1]} : vector<32x16xf32> to vector<32x8xf32>
    %253 = tpu.concatenate %251, %252 in 1 : vector<32x8xf32>, vector<32x8xf32> -> vector<32x16xf32>
    %254 = arith.mulf %244, %1 : vector<32x16xf32>
    %255 = arith.mulf %253, %2 : vector<32x16xf32>
    %256 = arith.addf %254, %255 : vector<32x16xf32>
    %257 = vector.extract_strided_slice %247 {offsets = [0, 8], sizes = [16, 8], strides = [1, 1]} : vector<16x16xf32> to vector<16x8xf32>
    %258 = vector.extract_strided_slice %247 {offsets = [0, 0], sizes = [16, 8], strides = [1, 1]} : vector<16x16xf32> to vector<16x8xf32>
    %259 = tpu.concatenate %257, %258 in 1 : vector<16x8xf32>, vector<16x8xf32> -> vector<16x16xf32>
    %260 = arith.mulf %247, %3 : vector<16x16xf32>
    %261 = arith.mulf %259, %4 : vector<16x16xf32>
    %262 = arith.addf %260, %261 : vector<16x16xf32>
    %263 = vector.extract_strided_slice %262 {offsets = [0, 0], sizes = [8, 16], strides = [1, 1]} : vector<16x16xf32> to vector<8x16xf32>
    %264 = vector.extract_strided_slice %262 {offsets = [8, 0], sizes = [8, 16], strides = [1, 1]} : vector<16x16xf32> to vector<8x16xf32>
    %265 = tpu.concatenate %263, %264 in 1 : vector<8x16xf32>, vector<8x16xf32> -> vector<8x32xf32>
    %266 = vector.extract_strided_slice %256 {offsets = [0, 0], sizes = [16, 16], strides = [1, 1]} : vector<32x16xf32> to vector<16x16xf32>
    %267 = vector.extract_strided_slice %262 {offsets = [0, 0], sizes = [8, 16], strides = [1, 1]} : vector<16x16xf32> to vector<8x16xf32>
    %cst_77 = arith.constant dense<0.000000e+00> : vector<16x8xf32>
    %268 = tpu.matmul %266, %267, %cst_77 {dimension_numbers = #tpu.dot_dimension_numbers<[1], [1], [0], [0], [0, 0, 1, 0], [], []>} : vector<16x16xf32>, vector<8x16xf32>, vector<16x8xf32> -> vector<16x8xf32>
    %269 = vector.extract_strided_slice %256 {offsets = [16, 0], sizes = [16, 16], strides = [1, 1]} : vector<32x16xf32> to vector<16x16xf32>
    %270 = vector.extract_strided_slice %262 {offsets = [8, 0], sizes = [8, 16], strides = [1, 1]} : vector<16x16xf32> to vector<8x16xf32>
    %cst_78 = arith.constant dense<0.000000e+00> : vector<16x8xf32>
    %271 = tpu.matmul %269, %270, %cst_78 {dimension_numbers = #tpu.dot_dimension_numbers<[1], [1], [0], [0], [0, 0, 1, 0], [], []>} : vector<16x16xf32>, vector<8x16xf32>, vector<16x8xf32> -> vector<16x8xf32>
    %272 = tpu.concatenate %268, %271 in 0 : vector<16x8xf32>, vector<16x8xf32> -> vector<32x8xf32>
    %273 = arith.addf %272, %11 : vector<32x8xf32>
    %cst_79 = arith.constant dense<0xFF800000> : vector<32xf32>
    %274 = vector.multi_reduction <maximumf>, %273, %cst_79 [1] : vector<32x8xf32> to vector<32xf32>
    %275 = vector.shape_cast %274 : vector<32xf32> to vector<32x1xf32>
    %276 = vector.broadcast %275 : vector<32x1xf32> to vector<32x8xf32>
    %277 = arith.subf %273, %276 : vector<32x8xf32>
    %278 = math.exp %277 : vector<32x8xf32>
    %cst_80 = arith.constant dense<0.000000e+00> : vector<32xf32>
    %279 = vector.multi_reduction <add>, %278, %cst_80 [1] : vector<32x8xf32> to vector<32xf32>
    %280 = vector.shape_cast %279 : vector<32xf32> to vector<32x1xf32>
    %281 = tpu.reciprocal %280 {approx = true} : vector<32x1xf32> -> vector<32x1xf32>
    %282 = vector.broadcast %281 : vector<32x1xf32> to vector<32x8xf32>
    %283 = arith.mulf %278, %282 : vector<32x8xf32>
    %284 = vector.extract_strided_slice %283 {offsets = [0, 0], sizes = [16, 8], strides = [1, 1]} : vector<32x8xf32> to vector<16x8xf32>
    %285 = vector.extract_strided_slice %250 {offsets = [0, 0], sizes = [8, 16], strides = [1, 1]} : vector<16x16xf32> to vector<8x16xf32>
    %cst_81 = arith.constant dense<0.000000e+00> : vector<16x16xf32>
    %286 = tpu.matmul %284, %285, %cst_81 {dimension_numbers = #tpu.dot_dimension_numbers<[1], [0], [0], [1], [0, 0, 1, 1], [], []>} : vector<16x8xf32>, vector<8x16xf32>, vector<16x16xf32> -> vector<16x16xf32>
    %287 = vector.extract_strided_slice %283 {offsets = [16, 0], sizes = [16, 8], strides = [1, 1]} : vector<32x8xf32> to vector<16x8xf32>
    %288 = vector.extract_strided_slice %250 {offsets = [8, 0], sizes = [8, 16], strides = [1, 1]} : vector<16x16xf32> to vector<8x16xf32>
    %cst_82 = arith.constant dense<0.000000e+00> : vector<16x16xf32>
    %289 = tpu.matmul %287, %288, %cst_82 {dimension_numbers = #tpu.dot_dimension_numbers<[1], [0], [0], [1], [0, 0, 1, 1], [], []>} : vector<16x8xf32>, vector<8x16xf32>, vector<16x16xf32> -> vector<16x16xf32>
    %290 = tpu.concatenate %286, %289 in 0 : vector<16x16xf32>, vector<16x16xf32> -> vector<32x16xf32>
    %291 = vector.extract_strided_slice %290 {offsets = [0, 0], sizes = [8, 16], strides = [1, 1]} : vector<32x16xf32> to vector<8x16xf32>
    %292 = vector.extract_strided_slice %290 {offsets = [8, 0], sizes = [8, 16], strides = [1, 1]} : vector<32x16xf32> to vector<8x16xf32>
    %293 = vector.extract_strided_slice %290 {offsets = [16, 0], sizes = [8, 16], strides = [1, 1]} : vector<32x16xf32> to vector<8x16xf32>
    %294 = vector.extract_strided_slice %290 {offsets = [24, 0], sizes = [8, 16], strides = [1, 1]} : vector<32x16xf32> to vector<8x16xf32>
    %295 = tpu.concatenate %291, %292, %293, %294 in 1 : vector<8x16xf32>, vector<8x16xf32>, vector<8x16xf32>, vector<8x16xf32> -> vector<8x64xf32>
    %296 = arith.mulf %295, %295 : vector<8x64xf32>
    %cst_83 = arith.constant dense<0.000000e+00> : vector<8xf32>
    %297 = vector.multi_reduction <add>, %296, %cst_83 [1] : vector<8x64xf32> to vector<8xf32>
    %298 = vector.shape_cast %297 : vector<8xf32> to vector<8x1xf32>
    %cst_84 = arith.constant 6.400000e+01 : f32
    %299 = vector.broadcast %cst_84 : f32 to vector<8x1xf32>
    %300 = arith.divf %298, %299 : vector<8x1xf32>
    %cst_85 = arith.constant 9.99999974E-6 : f32
    %301 = vector.broadcast %cst_85 : f32 to vector<8x1xf32>
    %302 = arith.addf %300, %301 : vector<8x1xf32>
    %303 = math.rsqrt %302 : vector<8x1xf32>
    %304 = vector.broadcast %303 : vector<8x1xf32> to vector<8x64xf32>
    %305 = arith.mulf %295, %304 : vector<8x64xf32>
    %306 = vector.broadcast %207 : vector<1x64xf32> to vector<8x64xf32>
    %307 = arith.mulf %305, %306 : vector<8x64xf32>
    %c1_86 = arith.constant 1 : index
    %c0_87 = arith.constant 0 : index
    %c0_88 = arith.constant 0 : index
    %308 = vector.load %arg7[%c1_86, %c0_87, %c0_88] : memref<2x64x64xbf16, #tpu.memory_space<vmem>>, vector<1x64x64xbf16>
    %309 = vector.shape_cast %308 : vector<1x64x64xbf16> to vector<64x64xbf16>
    %310 = math.absf %307 : vector<8x64xf32>
    %cst_89 = arith.constant dense<0xFF800000> : vector<8xf32>
    %311 = vector.multi_reduction <maximumf>, %310, %cst_89 [1] : vector<8x64xf32> to vector<8xf32>
    %312 = vector.shape_cast %311 : vector<8xf32> to vector<8x1xf32>
    %cst_90 = arith.constant 9.99999974E-6 : f32
    %313 = vector.broadcast %cst_90 : f32 to vector<8x1xf32>
    %314 = arith.maximumf %312, %313 : vector<8x1xf32>
    %cst_91 = arith.constant 1.270000e+02 : f32
    %315 = vector.broadcast %cst_91 : f32 to vector<8x1xf32>
    %316 = arith.divf %315, %314 : vector<8x1xf32>
    %317 = vector.broadcast %316 : vector<8x1xf32> to vector<8x64xf32>
    %318 = arith.mulf %307, %317 : vector<8x64xf32>
    %319 = math.roundeven %318 : vector<8x64xf32>
    %320 = arith.truncf %319 : vector<8x64xf32> to vector<8x64xbf16>
    %cst_92 = arith.constant dense<0.000000e+00> : vector<8x64xf32>
    %321 = tpu.matmul %320, %309, %cst_92 {dimension_numbers = #tpu.dot_dimension_numbers<[1], [0], [0], [1], [0, 0, 1, 1], [], []>} : vector<8x64xbf16>, vector<64x64xbf16>, vector<8x64xf32> -> vector<8x64xf32>
    %cst_93 = arith.constant 0.00787401571 : f32
    %322 = vector.broadcast %cst_93 : f32 to vector<8x1xf32>
    %323 = arith.mulf %314, %322 : vector<8x1xf32>
    %324 = vector.broadcast %323 : vector<8x1xf32> to vector<8x64xf32>
    %325 = arith.mulf %321, %324 : vector<8x64xf32>
    %326 = arith.addf %202, %325 : vector<8x64xf32>
    %327 = arith.mulf %326, %326 : vector<8x64xf32>
    %cst_94 = arith.constant dense<0.000000e+00> : vector<8xf32>
    %328 = vector.multi_reduction <add>, %327, %cst_94 [1] : vector<8x64xf32> to vector<8xf32>
    %329 = vector.shape_cast %328 : vector<8xf32> to vector<8x1xf32>
    %cst_95 = arith.constant 6.400000e+01 : f32
    %330 = vector.broadcast %cst_95 : f32 to vector<8x1xf32>
    %331 = arith.divf %329, %330 : vector<8x1xf32>
    %cst_96 = arith.constant 9.99999974E-6 : f32
    %332 = vector.broadcast %cst_96 : f32 to vector<8x1xf32>
    %333 = arith.addf %331, %332 : vector<8x1xf32>
    %334 = math.rsqrt %333 : vector<8x1xf32>
    %335 = vector.broadcast %334 : vector<8x1xf32> to vector<8x64xf32>
    %336 = arith.mulf %326, %335 : vector<8x64xf32>
    %337 = vector.broadcast %206 : vector<1x64xf32> to vector<8x64xf32>
    %338 = arith.mulf %336, %337 : vector<8x64xf32>
    %c1_97 = arith.constant 1 : index
    %c0_98 = arith.constant 0 : index
    %c0_99 = arith.constant 0 : index
    %339 = vector.load %arg8[%c1_97, %c0_98, %c0_99] : memref<2x64x256xbf16, #tpu.memory_space<vmem>>, vector<1x64x256xbf16>
    %340 = vector.shape_cast %339 : vector<1x64x256xbf16> to vector<64x256xbf16>
    %341 = math.absf %338 : vector<8x64xf32>
    %cst_100 = arith.constant dense<0xFF800000> : vector<8xf32>
    %342 = vector.multi_reduction <maximumf>, %341, %cst_100 [1] : vector<8x64xf32> to vector<8xf32>
    %343 = vector.shape_cast %342 : vector<8xf32> to vector<8x1xf32>
    %cst_101 = arith.constant 9.99999974E-6 : f32
    %344 = vector.broadcast %cst_101 : f32 to vector<8x1xf32>
    %345 = arith.maximumf %343, %344 : vector<8x1xf32>
    %cst_102 = arith.constant 1.270000e+02 : f32
    %346 = vector.broadcast %cst_102 : f32 to vector<8x1xf32>
    %347 = arith.divf %346, %345 : vector<8x1xf32>
    %348 = vector.broadcast %347 : vector<8x1xf32> to vector<8x64xf32>
    %349 = arith.mulf %338, %348 : vector<8x64xf32>
    %350 = math.roundeven %349 : vector<8x64xf32>
    %351 = arith.truncf %350 : vector<8x64xf32> to vector<8x64xbf16>
    %cst_103 = arith.constant dense<0.000000e+00> : vector<8x256xf32>
    %352 = tpu.matmul %351, %340, %cst_103 {dimension_numbers = #tpu.dot_dimension_numbers<[1], [0], [0], [1], [0, 0, 1, 1], [], []>} : vector<8x64xbf16>, vector<64x256xbf16>, vector<8x256xf32> -> vector<8x256xf32>
    %cst_104 = arith.constant 0.00787401571 : f32
    %353 = vector.broadcast %cst_104 : f32 to vector<8x1xf32>
    %354 = arith.mulf %345, %353 : vector<8x1xf32>
    %355 = vector.broadcast %354 : vector<8x1xf32> to vector<8x256xf32>
    %356 = arith.mulf %352, %355 : vector<8x256xf32>
    %357 = vector.extract_strided_slice %356 {offsets = [0, 0], sizes = [8, 128], strides = [1, 1]} : vector<8x256xf32> to vector<8x128xf32>
    %358 = vector.extract_strided_slice %356 {offsets = [0, 128], sizes = [8, 128], strides = [1, 1]} : vector<8x256xf32> to vector<8x128xf32>
    %cst_105 = arith.constant 0.000000e+00 : f32
    %359 = vector.broadcast %cst_105 : f32 to vector<8x128xf32>
    %360 = arith.maximumf %357, %359 : vector<8x128xf32>
    %361 = arith.mulf %360, %360 : vector<8x128xf32>
    %362 = arith.mulf %361, %358 : vector<8x128xf32>
    %363 = arith.mulf %362, %362 : vector<8x128xf32>
    %cst_106 = arith.constant dense<0.000000e+00> : vector<8xf32>
    %364 = vector.multi_reduction <add>, %363, %cst_106 [1] : vector<8x128xf32> to vector<8xf32>
    %365 = vector.shape_cast %364 : vector<8xf32> to vector<8x1xf32>
    %cst_107 = arith.constant 1.280000e+02 : f32
    %366 = vector.broadcast %cst_107 : f32 to vector<8x1xf32>
    %367 = arith.divf %365, %366 : vector<8x1xf32>
    %cst_108 = arith.constant 9.99999974E-6 : f32
    %368 = vector.broadcast %cst_108 : f32 to vector<8x1xf32>
    %369 = arith.addf %367, %368 : vector<8x1xf32>
    %370 = math.rsqrt %369 : vector<8x1xf32>
    %371 = vector.broadcast %370 : vector<8x1xf32> to vector<8x128xf32>
    %372 = arith.mulf %362, %371 : vector<8x128xf32>
    %373 = vector.broadcast %208 : vector<1x128xf32> to vector<8x128xf32>
    %374 = arith.mulf %372, %373 : vector<8x128xf32>
    %c1_109 = arith.constant 1 : index
    %c0_110 = arith.constant 0 : index
    %c0_111 = arith.constant 0 : index
    %375 = vector.load %arg9[%c1_109, %c0_110, %c0_111] : memref<2x128x64xbf16, #tpu.memory_space<vmem>>, vector<1x128x64xbf16>
    %376 = vector.shape_cast %375 : vector<1x128x64xbf16> to vector<128x64xbf16>
    %377 = math.absf %374 : vector<8x128xf32>
    %cst_112 = arith.constant dense<0xFF800000> : vector<8xf32>
    %378 = vector.multi_reduction <maximumf>, %377, %cst_112 [1] : vector<8x128xf32> to vector<8xf32>
    %379 = vector.shape_cast %378 : vector<8xf32> to vector<8x1xf32>
    %cst_113 = arith.constant 9.99999974E-6 : f32
    %380 = vector.broadcast %cst_113 : f32 to vector<8x1xf32>
    %381 = arith.maximumf %379, %380 : vector<8x1xf32>
    %cst_114 = arith.constant 1.270000e+02 : f32
    %382 = vector.broadcast %cst_114 : f32 to vector<8x1xf32>
    %383 = arith.divf %382, %381 : vector<8x1xf32>
    %384 = vector.broadcast %383 : vector<8x1xf32> to vector<8x128xf32>
    %385 = arith.mulf %374, %384 : vector<8x128xf32>
    %386 = math.roundeven %385 : vector<8x128xf32>
    %387 = arith.truncf %386 : vector<8x128xf32> to vector<8x128xbf16>
    %cst_115 = arith.constant dense<0.000000e+00> : vector<8x64xf32>
    %388 = tpu.matmul %387, %376, %cst_115 {dimension_numbers = #tpu.dot_dimension_numbers<[1], [0], [0], [1], [0, 0, 1, 1], [], []>} : vector<8x128xbf16>, vector<128x64xbf16>, vector<8x64xf32> -> vector<8x64xf32>
    %cst_116 = arith.constant 0.00787401571 : f32
    %389 = vector.broadcast %cst_116 : f32 to vector<8x1xf32>
    %390 = arith.mulf %381, %389 : vector<8x1xf32>
    %391 = vector.broadcast %390 : vector<8x1xf32> to vector<8x64xf32>
    %392 = arith.mulf %388, %391 : vector<8x64xf32>
    %393 = arith.addf %326, %392 : vector<8x64xf32>
    %c2 = arith.constant 2 : index
    %c0_117 = arith.constant 0 : index
    %c0_118 = arith.constant 0 : index
    %394 = vector.load %arg10[%c2, %c0_117, %c0_118] : memref<3x8x128xf32, #tpu.memory_space<vmem>>, vector<1x8x128xf32>
    %395 = vector.shape_cast %394 : vector<1x8x128xf32> to vector<8x128xf32>
    %396 = vector.extract_strided_slice %395 {offsets = [0, 0], sizes = [1, 64], strides = [1, 1]} : vector<8x128xf32> to vector<1x64xf32>
    %397 = arith.mulf %393, %393 : vector<8x64xf32>
    %cst_119 = arith.constant dense<0.000000e+00> : vector<8xf32>
    %398 = vector.multi_reduction <add>, %397, %cst_119 [1] : vector<8x64xf32> to vector<8xf32>
    %399 = vector.shape_cast %398 : vector<8xf32> to vector<8x1xf32>
    %cst_120 = arith.constant 6.400000e+01 : f32
    %400 = vector.broadcast %cst_120 : f32 to vector<8x1xf32>
    %401 = arith.divf %399, %400 : vector<8x1xf32>
    %cst_121 = arith.constant 9.99999974E-6 : f32
    %402 = vector.broadcast %cst_121 : f32 to vector<8x1xf32>
    %403 = arith.addf %401, %402 : vector<8x1xf32>
    %404 = math.rsqrt %403 : vector<8x1xf32>
    %405 = vector.broadcast %404 : vector<8x1xf32> to vector<8x64xf32>
    %406 = arith.mulf %393, %405 : vector<8x64xf32>
    %407 = vector.broadcast %396 : vector<1x64xf32> to vector<8x64xf32>
    %408 = arith.mulf %406, %407 : vector<8x64xf32>
    %c0_122 = arith.constant 0 : index
    %c0_123 = arith.constant 0 : index
    %409 = vector.load %arg11[%c0_122, %c0_123] : memref<64x256xf32, #tpu.memory_space<vmem>>, vector<64x256xf32>
    %cst_124 = arith.constant dense<0.000000e+00> : vector<8x256xf32>
    %410 = tpu.matmul %408, %409, %cst_124 {dimension_numbers = #tpu.dot_dimension_numbers<[1], [0], [0], [1], [0, 0, 1, 1], [], []>} : vector<8x64xf32>, vector<64x256xf32>, vector<8x256xf32> -> vector<8x256xf32>
    %c0_125 = arith.constant 0 : index
    %c0_126 = arith.constant 0 : index
    %411 = vector.load %arg12[%c0_125, %c0_126] : memref<8x256xf32, #tpu.memory_space<vmem>>, vector<8x256xf32>
    tpu.vector_store %arg12[%c0_125, %c0_126], %410 {strides = array<i32>} : memref<8x256xf32, #tpu.memory_space<vmem>>, vector<8x256xf32>,
    %412 = tpu.concatenate %74, %48, %265, %239 in 1 : vector<8x32xf32>, vector<8x32xf32>, vector<8x32xf32>, vector<8x32xf32> -> vector<8x128xf32>
    %c0_127 = arith.constant 0 : index
    %c0_128 = arith.constant 0 : index
    %413 = vector.load %arg13[%c0_127, %c0_128] : memref<8x128xf32, #tpu.memory_space<vmem>>, vector<8x128xf32>
    tpu.vector_store %arg13[%c0_127, %c0_128], %412 {strides = array<i32>} : memref<8x128xf32, #tpu.memory_space<vmem>>, vector<8x128xf32>,
    return
  }
  func.func @transform_0(%arg0: i32) -> (i32, i32) {
    %c0_i32 = arith.constant 0 : i32
    %c0_i32_0 = arith.constant 0 : i32
    %c0_i32_1 = arith.constant 0 : i32
    return %c0_i32, %c0_i32_0 : i32, i32
  }
  func.func @transform_1(%arg0: i32) -> (i32, i32) {
    %c0_i32 = arith.constant 0 : i32
    %c0_i32_0 = arith.constant 0 : i32
    %c0_i32_1 = arith.constant 0 : i32
    return %c0_i32, %c0_i32_0 : i32, i32
  }
  func.func @transform_2(%arg0: i32) -> (i32, i32) {
    %c0_i32 = arith.constant 0 : i32
    %c0_i32_0 = arith.constant 0 : i32
    %c0_i32_1 = arith.constant 0 : i32
    return %c0_i32, %c0_i32_0 : i32, i32
  }
  func.func @transform_3(%arg0: i32) -> (i32, i32) {
    %c0_i32 = arith.constant 0 : i32
    %c0_i32_0 = arith.constant 0 : i32
    %c0_i32_1 = arith.constant 0 : i32
    return %c0_i32, %c0_i32_0 : i32, i32
  }
  func.func @transform_4(%arg0: i32) -> (i32, i32) {
    %c0_i32 = arith.constant 0 : i32
    %c0_i32_0 = arith.constant 0 : i32
    %c0_i32_1 = arith.constant 0 : i32
    return %c0_i32, %c0_i32_0 : i32, i32
  }
  func.func @transform_5(%arg0: i32) -> (i32, i32, i32) {
    %c0_i32 = arith.constant 0 : i32
    %c0_i32_0 = arith.constant 0 : i32
    %c0_i32_1 = arith.constant 0 : i32
    %c0_i32_2 = arith.constant 0 : i32
    return %c0_i32, %c0_i32_0, %c0_i32_1 : i32, i32, i32
  }
  func.func @transform_6(%arg0: i32) -> (i32, i32, i32) {
    %c0_i32 = arith.constant 0 : i32
    %c0_i32_0 = arith.constant 0 : i32
    %c0_i32_1 = arith.constant 0 : i32
    %c0_i32_2 = arith.constant 0 : i32
    return %c0_i32, %c0_i32_0, %c0_i32_1 : i32, i32, i32
  }
  func.func @transform_7(%arg0: i32) -> (i32, i32, i32) {
    %c0_i32 = arith.constant 0 : i32
    %c0_i32_0 = arith.constant 0 : i32
    %c0_i32_1 = arith.constant 0 : i32
    %c0_i32_2 = arith.constant 0 : i32
    return %c0_i32, %c0_i32_0, %c0_i32_1 : i32, i32, i32
  }
  func.func @transform_8(%arg0: i32) -> (i32, i32, i32) {
    %c0_i32 = arith.constant 0 : i32
    %c0_i32_0 = arith.constant 0 : i32
    %c0_i32_1 = arith.constant 0 : i32
    %c0_i32_2 = arith.constant 0 : i32
    return %c0_i32, %c0_i32_0, %c0_i32_1 : i32, i32, i32
  }
  func.func @transform_9(%arg0: i32) -> (i32, i32, i32) {
    %c0_i32 = arith.constant 0 : i32
    %c0_i32_0 = arith.constant 0 : i32
    %c0_i32_1 = arith.constant 0 : i32
    %c0_i32_2 = arith.constant 0 : i32
    return %c0_i32, %c0_i32_0, %c0_i32_1 : i32, i32, i32
  }
  func.func @transform_10(%arg0: i32) -> (i32, i32) {
    %c0_i32 = arith.constant 0 : i32
    %c0_i32_0 = arith.constant 0 : i32
    %c0_i32_1 = arith.constant 0 : i32
    return %c0_i32, %c0_i32_0 : i32, i32
  }
  func.func @transform_11(%arg0: i32) -> (i32, i32) {
    %c0_i32 = arith.constant 0 : i32
    %c0_i32_0 = arith.constant 0 : i32
    %c0_i32_1 = arith.constant 0 : i32
    return %c0_i32, %c0_i32_0 : i32, i32
  }
  func.func @transform_12(%arg0: i32) -> (i32, i32) {
    %c0_i32 = arith.constant 0 : i32
    %c0_i32_0 = arith.constant 0 : i32
    %c0_i32_1 = arith.constant 0 : i32
    return %c0_i32, %c0_i32_0 : i32, i32
  }
}

</mosaic_0001>

<bundles_post_ra>
// kernel: transformer_forward.1
= control target key start
LH: loop header
LB: loop body
LE: loop exit
PB: predicated region body
PF: predicated region fallthrough
CT: control target
= control target key end

     0   :  { %vm63_vm0 = vcmask 523264   ;;  %s3286_s0 = inlined_call_operand.vmem [shape: f32[8,64], index: 0, kind: input, shape index: {}]   ;;  %s3287_s1 = inlined_call_operand.vmem [shape: f32[32,16], index: 1, kind: input, shape index: {}]   ;;  %s3288_s2 = inlined_call_operand.vmem [shape: f32[32,16], index: 2, kind: input, shape index: {}]   ;;  %s3289_s3 = inlined_call_operand.vmem [shape: f32[16,16], index: 3, kind: input, shape index: {}]   ;;  %s3290_s4 = inlined_call_operand.vmem [shape: f32[16,16], index: 4, kind: input, shape index: {}]   ;;  %s3291_s5 = inlined_call_operand.vmem [shape: bf16[2,64,128], index: 5, kind: input, shape index: {}]   ;;  %s3292_s6 = inlined_call_operand.vmem [shape: bf16[2,64,64], index: 6, kind: input, shape index: {}]   ;;  %s3293_s7 = inlined_call_operand.vmem [shape: bf16[2,64,256], index: 7, kind: input, shape index: {}]   ;;  %s3294_s8 = inlined_call_operand.vmem [shape: bf16[2,128,64], index: 8, kind: input, shape index: {}]   ;;  %s3295_s9 = inlined_call_operand.vmem [shape: f32[3,8,128], index: 9, kind: input, shape index: {}]   ;;  %s3296_s10 = inlined_call_operand.vmem [shape: f32[64,256], index: 10, kind: input, shape index: {}]   ;;  %s3297_s11 = inlined_call_operand.hbm [shape: f32[8,256], index: 11, kind: output, shape index: {0}]   ;;  %s3298_s12 = inlined_call_operand.vmem [shape: f32[8,128], index: 12, kind: output, shape index: {1}]  }
   0x1   :  { %v2669_v0 = vld [vmem:[%s3286_s0] sm:$0xff] }
   0x2   :  { %v62_v1 = vmul.f32 %v2669_v0, %v2669_v0 }
   0x4   :  { %v64_v2 = vsel %vm63_vm0, %v62_v1, 0.0 }
   0x5   :  { %65 = vadd.xlane.f32.xlu0 %v64_v2 }
   0x6   :  { %18 = vsyncpa [#allocation3], 0  ;;  %v55_v5 = vlaneseq  ;;  %v2683_v9 = vld [vmem:[%s3295_s9] sm:$0xff]  ;;  %v2585_v17 = vmov 0.0   ;;  %v2440_v18 = vld [vmem:[%s3291_s5 + $0x8] sm:$0xff]   ;;  %vm2586_vm1 = vmmov 0  }
   0x7   :  { %v2439_v16 = vld [vmem:[%s3291_s5] sm:$0xff]   ;;  %2271 = vmatprep.subr.bf16.mxu0 %v2585_v17  ;;  %v2441_v19 = vld [vmem:[%s3291_s5 + $0x10] sm:$0xff]   ;;  %v2442_v20 = vld [vmem:[%s3291_s5 + $0x18] sm:$0xff]   ;;  %2279 = vmatprep.mubr.msk.bf16.mxu0 %vm2586_vm1, %v2585_v17  ;;  %s2587_s14 = smov 72   ;;  %s2588_s15 = smov 112   ;;  %vm198_vm2 = vcmask 64512  }
   0x8   :  { %v2675_v7 = vshrl.u32 %v55_v5, 7  ;;  %2272 = vmatpush3.bf16.msra.mxu0 %v2439_v16  ;;  %s2589_s16 = smov 56   ;;  %v51_v35 = vld [vmem:[%s3289_s3] sm:$0xff]  ;;  %s2590_s19 = smov 64   ;;  %v52_v37 = vld [vmem:[%s3289_s3 + $0x8] sm:$0xff]  ;;  %vm259_vm3 = vcmask 130048  }
   0x9   :  { %2273 = vmatprep.subr.bf16.mxu0 %v2585_v17  ;;  %v2735_v39 = vld [vmem:[%s3290_s4] sm:$0xff]  ;;  %s2591_s23 = smov 96   ;;  %s2592_s24 = smov 80   ;;  %v2752_v43 = vld [vmem:[%s3290_s4 + $0x8] sm:$0xff]  ;;  %vm658_vm5 = vcmask 261120   ;;  %vm660_vm6 = vcmask 392192  }
   0xa   :  { %v2678_v8 = vsub.s32 0, %v2675_v7  ;;  %s2593_s3 = smov 8   ;;  %s2594_s27 = smov 120   ;;  %v2781_v58 = vld [vmem:[%s3288_s2] sm:$0xff]  ;;  %vm2071_vm7 = vcmask 785408  }
   0xb   :  { %v2786_v59 = vld [vmem:[%s3287_s1] sm:$0xff]  ;;  %s2598_s30 = smov 48   ;;  %s2600_s17 = smov [#allocation2]  }
   0xc   :  { %v75_v10 = vrot.slane %v2683_v9, %v2678_v8  ;;  %2274 = vmatpush3.bf16.msra.mxu0 %v2440_v18 }
   0xd   :  { %2275 = vmatprep.subr.bf16.mxu0 %v2585_v17 }
  0x10   :  { %2276 = vmatpush3.bf16.msra.mxu0 %v2441_v19 }
  0x11   :  { %2277 = vmatprep.subr.bf16.mxu0 %v2585_v17 }
  0x14   :  { %2278 = vmatpush3.bf16.msra.mxu0 %v2442_v20 }
  0x15   :  { %2303 = vmatprep.subr.bf16.mxu0 %v2585_v17 }
  0x92   :  { %v66_v3 = vpop.xlane.xlu0 %65 }
  0x93   :  { %v68_v4 = vmul.f32 0.015625, %v66_v3 }
  0x95   :  { %v69_v6 = vadd.f32 1e-05, %v68_v4  ;;  %v2796_v4 = vld [vmem:[%s3288_s2 + $0x8] sm:$0xff] }
  0x97   :  { %2495 = vrsqrt.f32 %v69_v6 }
  0xa1   :  { %v2496_v11 = vpop.eup %2495 }
  0xa2   :  { %v71_v12 = vmul.f32 %v2496_v11, %v2669_v0 }
  0xa4   :  { %v76_v13 = vmul.f32 %v75_v10, %v71_v12  ;;  %v2802_v12 = vld [vmem:[%s3288_s2 + $0x10] sm:$0xff] }
  0xa6   :  { %v85_v14 = vand.u32 2147483647, %v76_v13 }
  0xa8   :  { %v86_v15 = vsel %vm63_vm0, %v85_v14, -inf  ;;  %v2808_v14 = vld [vmem:[%s3287_s1 + $0x8] sm:$0xff] }
  0xa9   :  { %87 = vmax.xlane.f32.xlu0 %v86_v15  ;;  %v2813_v15 = vld [vmem:[%s3287_s1 + $0x10] sm:$0xff] }
 0x136   :  { %v88_v21 = vpop.xlane.xlu0 %87 }
 0x137   :  { %v89_v22 = vmax.f32 %v88_v21, 1e-05 }
 0x139   :  { %2497 = vrcp.f32 %v89_v22  ;;  %v162_v28 = vmul.f32 0.007874016, %v89_v22 }
 0x143   :  { %v2498_v23 = vpop.eup %2497 }
 0x144   :  { %v91_v24 = vmul.f32 127.0, %v2498_v23 }
 0x146   :  { %v92_v25 = vmul.f32 %v91_v24, %v76_v13 }
 0x148   :  { %v2415_v26 = vround.rtne.f32 %v92_v25 }
 0x14a   :  { %v94_v27 = vpack.c.bf16 %v2415_v26, %v2415_v26  ;;  %v2831_v26 = vld [vmem:[%s3288_s2 + $0x18] sm:$0xff]  ;;  %s2597_s2 = smov 16  }
 0x14c   :  { %2280 = vmatmul.mubr.msk.bf16.vlgmr.msra.gmra.mrb[0].mxu0 %vm63_vm0, %v94_v27 }
 0x14d   :  { %2311 = vmatprep.mubr.msk.bf16.mxu0 %vm2586_vm1, %v2585_v17 }
 0x21f   :  { %v156_v29 = vpop.f32.mrb[0].mxu0 }
 0x220   :  { %v2711_v30 = vmul.f32 %v162_v28, %v156_v29  ;;  %v2281_v31 = vpop.f32.mrb[1].mxu0  ;;  %v2837_v28 = vld [vmem:[%s3287_s1 + $0x18] sm:$0xff]  ;;  %s2596_s1 = smov 32  }
 0x221   :  { %v159_v32 = vpop.f32.mrb[2].mxu0 }
 0x222   :  { %221 = vrot.lane.b32.xlu0 %v2711_v30, %s2587_s14  ;;  %165 = vrot.lane.b32.xlu1 %v2711_v30, %s2588_s15  ;;  %v2282_v33 = vpop.f32.mrb[3].mxu0  ;;  %v203_v63 = vmul.f32 %v2711_v30, %v2786_v59 }
 0x226   :  { %215 = vrot.lane.b32.xlu1 %v2711_v30, %s2589_s16 }
 0x294   :  { %v2719_v34 = vpop.permute.xlu1 %165  ;;  %v222_v38 = vpop.permute.xlu0 %221 }
 0x295   :  { %217 = vrot.lane.b32.xlu1 %v2719_v34, %s2589_s16  ;;  %v204_v20 = vmul.f32 %v2719_v34, %v2808_v14 }
 0x298   :  { %v216_v36 = vpop.permute.xlu1 %215 }
 0x299   :  { %223 = vrot.lane.b32.xlu1 %v2719_v34, %s2587_s14  ;;  %v227_v40 = vsel %vm198_vm2, %v216_v36, %v222_v38  ;;  %v2595_v36 = vmov -1e+30  }
 0x29a   :  { %v239_v41 = vmul.f32 %v227_v40, %v2735_v39 }
 0x29d   :  { %231 = vrot.lane.b32.xlu1 %v51_v35, %s2590_s19  ;;  %v58_v35 = vand.u32 127, %v55_v5 }
 0x29f   :  { %vm59_vm4 = vcmp.le.s32.totalorder %v58_v35, %v2675_v7 }
 0x2a1   :  { %233 = vrot.lane.b32.xlu1 %v52_v37, %s2590_s19  ;;  %v2846_v37 = vsel %vm59_vm4, 0.0, %v2595_v36 }
 0x2a5   :  { %243 = vrot.lane.b32.xlu1 %v239_v41, %s2590_s19 }
 0x2a9   :  { %168 = vrot.lane.b32.xlu1 %v2711_v30, %s2591_s23 }
 0x2ad   :  { %171 = vrot.lane.b32.xlu1 %v2711_v30, %s2592_s24 }
 0x2b1   :  { %186 = vrot.lane.b32.xlu1 %v2711_v30, %s2593_s3 }
 0x2b5   :  { %188 = vrot.lane.b32.xlu1 %v2719_v34, %s2593_s3 }
 0x307   :  { %v218_v42 = vpop.permute.xlu1 %217 }
 0x30b   :  { %v224_v44 = vpop.permute.xlu1 %223 }
 0x30c   :  { %v228_v45 = vsel %vm198_vm2, %v218_v42, %v224_v44 }
 0x30d   :  { %v240_v46 = vmul.f32 %v228_v45, %v2752_v43 }
 0x30f   :  { %245 = vrot.lane.b32.xlu0 %v240_v46, %s2590_s19  ;;  %v2757_v47 = vpop.permute.xlu1 %231 }
 0x310   :  { %v237_v51 = vmul.f32 %v2757_v47, %v2711_v30 }
 0x313   :  { %174 = vrot.lane.b32.xlu0 %v2711_v30, %s2594_s27  ;;  %v2761_v48 = vpop.permute.xlu1 %233 }
 0x314   :  { %v238_v54 = vmul.f32 %v2761_v48, %v2719_v34 }
 0x317   :  { %176 = vrot.lane.b32.xlu0 %v2719_v34, %s2594_s27  ;;  %v244_v49 = vpop.permute.xlu1 %243 }
 0x318   :  { %v249_v52 = vadd.f32 %v244_v49, %v237_v51 }
 0x31b   :  { %v169_v50 = vpop.permute.xlu1 %168 }
 0x31c   :  { %190 = vrot.lane.b32.xlu0 %v169_v50, %s2593_s3  ;;  %178 = vrot.lane.b32.xlu1 %v169_v50, %s2594_s27  ;;  %v205_v21 = vmul.f32 %v169_v50, %v2813_v15 }
 0x31f   :  { %v172_v53 = vpop.permute.xlu1 %171 }
 0x320   :  { %252 = vrot.lane.b32.xlu0 %v249_v52, %s2590_s19  ;;  %180 = vrot.lane.b32.xlu1 %v172_v53, %s2594_s27  ;;  %v206_v32 = vmul.f32 %v172_v53, %v2837_v28 }
 0x323   :  { %v187_v57 = vpop.permute.xlu1 %186 }
 0x324   :  { %192 = vrot.lane.b32.xlu0 %v172_v53, %s2593_s3 }
 0x327   :  { %v189_v3 = vpop.permute.xlu1 %188 }
 0x381   :  { %v246_v55 = vpop.permute.xlu0 %245 }
 0x382   :  { %v2774_v56 = vadd.f32 %v246_v55, %v238_v54 }
 0x384   :  { %344 = vrot.lane.b32.xlu1 %v2774_v56, %s2590_s19 }
 0x385   :  { %v175_v60 = vpop.permute.xlu0 %174 }
 0x386   :  { %v199_v61 = vsel %vm198_vm2, %v175_v60, %v187_v57 }
 0x387   :  { %v207_v62 = vmul.f32 %v199_v61, %v2781_v58 }
 0x389   :  { %v177_v1 = vpop.permute.xlu0 %176  ;;  %v211_v2 = vadd.f32 %v207_v62, %v203_v63 }
 0x38a   :  { %v200_v6 = vsel %vm198_vm2, %v177_v1, %v189_v3 }
 0x38b   :  { %2285 = vmatprep.mubr.msk.f32.mxu1 %vm259_vm3, %v211_v2  ;;  %v208_v16 = vmul.f32 %v200_v6, %v2796_v4 }
 0x38d   :  { %v212_v22 = vadd.f32 %v208_v16, %v204_v20 }
 0x38e   :  { %v191_v10 = vpop.permute.xlu0 %190  ;;  %v179_v11 = vpop.permute.xlu1 %178 }
 0x38f   :  { %v201_v13 = vsel %vm198_vm2, %v179_v11, %v191_v10 }
 0x390   :  { %v209_v18 = vmul.f32 %v201_v13, %v2802_v12 }
 0x392   :  { %v2817_v19 = vpop.permute.xlu0 %252  ;;  %v213_v23 = vadd.f32 %v209_v18, %v205_v21  ;;  %v181_v25 = vpop.permute.xlu1 %180 }
 0x393   :  { %2283 = vmatprep.subr.msk.mxu1 %vm259_vm3, %v2817_v19 }
 0x394   :  { %2284 = vmatpush3.xpose.msk.msra.mxu1 %vm259_vm3, %v2817_v19 }
 0x396   :  { %v193_v24 = vpop.permute.xlu0 %192 }
 0x397   :  { %2286 = vmatmul.mubr.msk.f32.vlgmr.msra.gmra.mrb[0].mxu1 %vm259_vm3, %v212_v22  ;;  %v202_v27 = vsel %vm198_vm2, %v181_v25, %v193_v24 }
 0x398   :  { %2290 = vmatprep.mubr.msk.f32.mxu1 %vm259_vm3, %v213_v23  ;;  %v210_v29 = vmul.f32 %v202_v27, %v2831_v26 }
 0x39a   :  { %v214_v33 = vadd.f32 %v210_v29, %v206_v32 }
 0x3f6   :  { %v345_v31 = vpop.permute.xlu1 %344 }
 0x3f7   :  { %2288 = vmatprep.subr.msk.mxu1 %vm259_vm3, %v345_v31 }
 0x3f8   :  { %2289 = vmatpush3.xpose.msk.msra.mxu1 %vm259_vm3, %v345_v31 }
 0x3fb   :  { %2291 = vmatmul.mubr.msk.f32.vlgmr.msra.gmra.mrb[2].mxu1 %vm259_vm3, %v214_v33 }
 0x46a   :  { %v2287_v38 = vpop.f32.mrb[0].mxu1 }
 0x46b   :  { %v430_v40 = vadd.f32 %v2287_v38, %v2846_v37  ;;  %v335_v41 = vpop.f32.mrb[1].mxu1 }
 0x46c   :  { %v429_v42 = vadd.f32 %v335_v41, %v2846_v37 }
 0x46d   :  { %v436_v44 = vsel %vm198_vm2, %v430_v40, -inf }
 0x46e   :  { %437 = vmax.xlane.f32.xlu1 %v436_v44  ;;  %v433_v45 = vsel %vm198_vm2, %v429_v42, -inf }
 0x46f   :  { %434 = vmax.xlane.f32.xlu0 %v433_v45 }
 0x4ce   :  { %v2292_v46 = vpop.f32.mrb[2].mxu1 }
 0x4cf   :  { %v420_v49 = vpop.f32.mrb[3].mxu1  ;;  %v432_v50 = vadd.f32 %v2292_v46, %v2846_v37 }
 0x4d0   :  { %v431_v5 = vadd.f32 %v420_v49, %v2846_v37 }
 0x4d1   :  { %v442_v52 = vsel %vm198_vm2, %v432_v50, -inf }
 0x4d2   :  { %v439_v51 = vsel %vm198_vm2, %v431_v5, -inf }
 0x4d3   :  { %440 = vmax.xlane.f32.xlu0 %v439_v51 }
 0x4d7   :  { %443 = vmax.xlane.f32.xlu0 %v442_v52 }
 0x4fb   :  { %v438_v53 = vpop.xlane.xlu1 %437 }
 0x4fc   :  { %v446_v54 = vsub.f32 %v430_v40, %v438_v53  ;;  %v435_v55 = vpop.xlane.xlu0 %434 }
 0x4fd   :  { %v445_v57 = vsub.f32 %v429_v42, %v435_v55 }
 0x4fe   :  { %v451_v60 = vmul.f32 1.442695, %v446_v54 }
 0x4ff   :  { %v449_v61 = vmul.f32 1.442695, %v445_v57 }
 0x500   :  { %2499 = vpow2.f32 %v451_v60 }
 0x501   :  { %2501 = vpow2.f32 %v449_v61 }
 0x50a   :  { %v2500_v62 = vpop.eup %2499 }
 0x50b   :  { %v2502_v63 = vpop.eup %2501  ;;  %v460_v1 = vsel %vm198_vm2, %v2500_v62, 0.0 }
 0x50c   :  { %461 = vadd.xlane.f32.xlu0 %v460_v1  ;;  %v457_v2 = vsel %vm198_vm2, %v2502_v63, 0.0 }
 0x50d   :  { %458 = vadd.xlane.f32.xlu1 %v457_v2 }
 0x560   :  { %v441_v3 = vpop.xlane.xlu0 %440 }
 0x561   :  { %v447_v6 = vsub.f32 %v431_v5, %v441_v3 }
 0x563   :  { %v453_v10 = vmul.f32 1.442695, %v447_v6 }
 0x564   :  { %v444_v11 = vpop.xlane.xlu0 %443 }
 0x565   :  { %2503 = vpow2.f32 %v453_v10  ;;  %v448_v13 = vsub.f32 %v432_v50, %v444_v11  ;;  %v2443_v11 = vld [vmem:[%s3292_s6] sm:$0xff]  }
 0x566   :  { %2304 = vmatpush3.bf16.msra.mxu0 %v2443_v11 }
 0x567   :  { %v455_v16 = vmul.f32 1.442695, %v448_v13  ;;  %2305 = vmatprep.subr.bf16.mxu0 %v2585_v17  ;;  %v2444_v13 = vld [vmem:[%s3292_s6 + $0x8] sm:$0xff]  }
 0x569   :  { %2505 = vpow2.f32 %v455_v16  ;;  %v2445_v16 = vld [vmem:[%s3292_s6 + $0x10] sm:$0xff]  }
 0x56a   :  { %2306 = vmatpush3.bf16.msra.mxu0 %v2444_v13 }
 0x56b   :  { %2307 = vmatprep.subr.bf16.mxu0 %v2585_v17 }
 0x56e   :  { %2308 = vmatpush3.bf16.msra.mxu0 %v2445_v16 }
 0x56f   :  { %v2504_v18 = vpop.eup %2503  ;;  %2309 = vmatprep.subr.bf16.mxu0 %v2585_v17 }
 0x570   :  { %v463_v20 = vsel %vm198_vm2, %v2504_v18, 0.0 }
 0x571   :  { %464 = vadd.xlane.f32.xlu1 %v463_v20 }
 0x573   :  { %v2506_v21 = vpop.eup %2505 }
 0x574   :  { %v466_v22 = vsel %vm198_vm2, %v2506_v21, 0.0 }
 0x575   :  { %467 = vadd.xlane.f32.xlu0 %v466_v22 }
 0x582   :  { %477 = vrot.lane.b32.xlu1 %v2711_v30, %s2596_s1 }
 0x58b   :  { %561 = vrot.lane.b32.xlu0 %v2719_v34, %s2596_s1 }
 0x599   :  { %v462_v27 = vpop.xlane.xlu0 %461 }
 0x59a   :  { %v459_v23 = vpop.xlane.xlu1 %458 }
 0x59b   :  { %2507 = vrcp.f32 %v459_v23 }
 0x59c   :  { %2509 = vrcp.f32 %v462_v27 }
 0x5a5   :  { %v2508_v24 = vpop.eup %2507 }
 0x5a6   :  { %v473_v25 = vmul.f32 %v2508_v24, %v2502_v63  ;;  %v2510_v31 = vpop.eup %2509 }
 0x5a7   :  { %v474_v35 = vmul.f32 %v2510_v31, %v2500_v62  ;;  %v672_v62 = vsub.s32 2, %v2675_v7 }
 0x5a8   :  { %2295 = vmatprep.mubr.msk.f32.mxu1 %vm198_vm2, %v473_v25 }
 0x5a9   :  { %v673_v63 = vrot.slane %v2683_v9, %v672_v62 }
 0x5fe   :  { %v465_v29 = vpop.xlane.xlu1 %464 }
 0x5ff   :  { %2511 = vrcp.f32 %v465_v29 }
 0x602   :  { %v478_v32 = vpop.permute.xlu1 %477  ;;  %v468_v33 = vpop.xlane.xlu0 %467 }
 0x603   :  { %2513 = vrcp.f32 %v468_v33  ;;  %2293 = vmatprep.subr.mxu1 %v478_v32 }
 0x604   :  { %2294 = vmatpush3.msra.mxu1 %v478_v32 }
 0x605   :  { %2296 = vmatmul.mubr.msk.f32.vlgmr.msra.gmra.mrb[4].mxu1 %vm198_vm2, %v474_v35 }
 0x606   :  { %v562_v34 = vpop.permute.xlu0 %561 }
 0x607   :  { %2298 = vmatprep.subr.mxu1 %v562_v34 }
 0x608   :  { %2299 = vmatpush3.msra.mxu1 %v562_v34 }
 0x609   :  { %v2512_v36 = vpop.eup %2511 }
 0x60a   :  { %v475_v38 = vmul.f32 %v2512_v36, %v2504_v18  ;;  %v2446_v18 = vld [vmem:[%s3292_s6 + $0x18] sm:$0xff]  }
 0x60b   :  { %2310 = vmatpush3.bf16.msra.mxu0 %v2446_v18 }
 0x60c   :  { %2300 = vmatprep.mubr.msk.f32.mxu1 %vm198_vm2, %v475_v38  ;;  %2315 = vmatprep.subr.bf16.mxu0 %v2585_v17 }
 0x60d   :  { %v2514_v40 = vpop.eup %2513 }
 0x60e   :  { %v476_v41 = vmul.f32 %v2514_v40, %v2506_v21 }
 0x610   :  { %2301 = vmatmul.mubr.msk.f32.vlgmr.msra.gmra.mrb[6].mxu1 %vm198_vm2, %v476_v41 }
 0x6d8   :  { %v2297_v42 = vpop.f32.mrb[4].mxu1 }
 0x6d9   :  { %646 = vrot.lane.b32.xlu1 %v2297_v42, %s2597_s2  ;;  %v552_v44 = vpop.f32.mrb[5].mxu1 }
 0x6e3   :  { %v2302_v45 = vpop.f32.mrb[6].mxu1 }
 0x6e4   :  { %654 = vrot.lane.b32.xlu0 %v2302_v45, %s2598_s30  ;;  %v636_v46 = vpop.f32.mrb[7].mxu1  ;;  %v773_v45 = vsub.s32 1, %v2675_v7 }
 0x6e5   :  { %650 = vrot.lane.b32.xlu1 %v636_v46, %s2596_s1 }
 0x6e6   :  { %v774_v46 = vrot.slane %v2683_v9, %v773_v45 }
 0x74b   :  { %v647_v49 = vpop.permute.xlu1 %646 }
 0x74c   :  { %v657_v5 = vsel %vm259_vm3, %v552_v44, %v647_v49 }
 0x756   :  { %v655_v51 = vpop.permute.xlu0 %654 }
 0x757   :  { %v651_v50 = vpop.permute.xlu1 %650 }
 0x758   :  { %v659_v52 = vsel %vm658_vm5, %v657_v5, %v651_v50 }
 0x759   :  { %v661_v53 = vsel %vm660_vm6, %v659_v52, %v655_v51  ;;  %v2449_v52 = vld [vmem:[%s3293_s7 + $0x4] ss:$8 sps:$4 sm:$0xff]  }
 0x75a   :  { %v662_v54 = vmul.f32 %v661_v53, %v661_v53  ;;  %837 = vmatprep.subr.bf16.mxu1 %v2449_v52  ;;  %v2465_v52 = vld [vmem:[%s3294_s8 + $0x30] sm:$0xff]  }
 0x75c   :  { %v663_v55 = vsel %vm63_vm0, %v662_v54, 0.0  ;;  %v2452_v54 = vld [vmem:[%s3293_s7 + $0x14] ss:$8 sps:$4 sm:$0xff]  }
 0x75d   :  { %664 = vadd.xlane.f32.xlu1 %v663_v55  ;;  %v2450_v55 = vld [vmem:[%s3293_s7 + $0x10] ss:$8 sps:$4 sm:$0xff]  }
 0x7ea   :  { %v665_v57 = vpop.xlane.xlu1 %664 }
 0x7eb   :  { %v666_v60 = vmul.f32 0.015625, %v665_v57  ;;  %v2455_v57 = vld [vmem:[%s3293_s7 + $0x24] ss:$8 sps:$4 sm:$0xff]  }
 0x7ed   :  { %v667_v61 = vadd.f32 1e-05, %v666_v60  ;;  %v2453_v60 = vld [vmem:[%s3293_s7 + $0x20] ss:$8 sps:$4 sm:$0xff]  }
 0x7ef   :  { %2515 = vrsqrt.f32 %v667_v61  ;;  %v2458_v61 = vld [vmem:[%s3293_s7 + $0x34] ss:$8 sps:$4 sm:$0xff]  }
 0x7f9   :  { %v2516_v1 = vpop.eup %2515 }
 0x7fa   :  { %v669_v2 = vmul.f32 %v2516_v1, %v661_v53  ;;  %v2447_v53 = vld [vmem:[%s3293_s7] ss:$8 sps:$4 sm:$0xff]   ;;  %v2599_v1 = vmov 0  }
 0x7fb   :  { %838 = vmatpush1.bf16.msra.mxu1 %v2447_v53  ;;  %869 = vmatprep.mubr.bf16.mxu1 %v2599_v1  ;;  %v2466_v53 = vld [vmem:[%s3294_s8 + $0x38] sm:$0xff]  }
 0x7fc   :  { %v674_v3 = vmul.f32 %v673_v63, %v669_v2  ;;  %839 = vmatprep.subr.bf16.mxu1 %v2452_v54  ;;  %v2456_v63 = vld [vmem:[%s3293_s7 + $0x30] ss:$8 sps:$4 sm:$0xff]  }
 0x7fe   :  { %v683_v6 = vand.u32 2147483647, %v674_v3 }
 0x7ff   :  { %840 = vmatpush1.bf16.msra.mxu1 %v2450_v55 }
 0x800   :  { %v684_v10 = vsel %vm63_vm0, %v683_v6, -inf  ;;  %841 = vmatprep.subr.bf16.mxu1 %v2455_v57 }
 0x801   :  { %685 = vmax.xlane.f32.xlu0 %v684_v10 }
 0x803   :  { %842 = vmatpush1.bf16.msra.mxu1 %v2453_v60 }
 0x804   :  { %843 = vmatprep.subr.bf16.mxu1 %v2458_v61 }
 0x807   :  { %844 = vmatpush1.bf16.msra.mxu1 %v2456_v63 }
 0x808   :  { %2335 = vmatprep.subr.bf16.mxu1 %v2585_v17 }
 0x88e   :  { %v686_v20 = vpop.xlane.xlu0 %685 }
 0x88f   :  { %v687_v21 = vmax.f32 %v686_v20, 1e-05 }
 0x891   :  { %2517 = vrcp.f32 %v687_v21  ;;  %v760_v29 = vmul.f32 0.007874016, %v687_v21 }
 0x89b   :  { %v2518_v22 = vpop.eup %2517 }
 0x89c   :  { %v689_v23 = vmul.f32 127.0, %v2518_v22 }
 0x89e   :  { %v690_v24 = vmul.f32 %v689_v23, %v674_v3 }
 0x8a0   :  { %v2416_v25 = vround.rtne.f32 %v690_v24 }
 0x8a2   :  { %v692_v27 = vpack.c.bf16 %v2416_v25, %v2416_v25 }
 0x8a4   :  { %2312 = vmatmul.mubr.msk.bf16.vlgmr.msra.gmra.mrb[4].mxu0 %vm63_vm0, %v692_v27 }
 0x8a5   :  { %2331 = vmatprep.mubr.msk.bf16.mxu0 %vm2586_vm1, %v2585_v17 }
 0x977   :  { %v754_v31 = vpop.f32.mrb[4].mxu0 }
 0x978   :  { %v761_v32 = vmul.f32 %v760_v29, %v754_v31  ;;  %v2313_v33 = vpop.f32.mrb[5].mxu0 }
 0x979   :  { %v757_v35 = vpop.f32.mrb[6].mxu0  ;;  %v2459_v33 = vld [vmem:[%s3294_s8] sm:$0xff]  }
 0x97a   :  { %v2900_v34 = vadd.f32 %v761_v32, %v2669_v0  ;;  %v2314_v36 = vpop.f32.mrb[7].mxu0  ;;  %2316 = vmatpush3.bf16.msra.mxu0 %v2459_v33  ;;  %v2460_v35 = vld [vmem:[%s3294_s8 + $0x8] sm:$0xff]  }
 0x97b   :  { %2317 = vmatprep.subr.bf16.mxu0 %v2585_v17  ;;  %v2461_v36 = vld [vmem:[%s3294_s8 + $0x10] sm:$0xff]  }
 0x97c   :  { %v763_v38 = vmul.f32 %v2900_v34, %v2900_v34 }
 0x97e   :  { %v764_v40 = vsel %vm63_vm0, %v763_v38, 0.0  ;;  %2318 = vmatpush3.bf16.msra.mxu0 %v2460_v35  ;;  %v2467_v35 = vld [vmem:[%s3291_s5 + $0x20] sm:$0xff]  }
 0x97f   :  { %765 = vadd.xlane.f32.xlu0 %v764_v40  ;;  %2319 = vmatprep.subr.bf16.mxu0 %v2585_v17 }
 0x982   :  { %2320 = vmatpush3.bf16.msra.mxu0 %v2461_v36  ;;  %v2468_v36 = vld [vmem:[%s3291_s5 + $0x28] sm:$0xff]  }
 0x983   :  { %2321 = vmatprep.subr.bf16.mxu0 %v2585_v17 }
 0xa0c   :  { %v766_v41 = vpop.xlane.xlu0 %765 }
 0xa0d   :  { %v767_v42 = vmul.f32 0.015625, %v766_v41 }
 0xa0f   :  { %v768_v44 = vadd.f32 1e-05, %v767_v42  ;;  %v894_v42 = vsub.s32 3, %v2675_v7  ;;  %v2491_v7 = vld [vmem:[%s3294_s8 + $0x60] sm:$0xff]  }
 0xa11   :  { %2519 = vrsqrt.f32 %v768_v44  ;;  %v895_v44 = vrot.slane %v2683_v9, %v894_v42  ;;  %v2464_v9 = vld [vmem:[%s3294_s8 + $0x28] sm:$0xff]  }
 0xa1b   :  { %v2520_v49 = vpop.eup %2519 }
 0xa1c   :  { %v770_v0 = vmul.f32 %v2520_v49, %v2900_v34 }
 0xa1e   :  { %v775_v5 = vmul.f32 %v774_v46, %v770_v0 }
 0xa20   :  { %v784_v50 = vand.u32 2147483647, %v775_v5 }
 0xa22   :  { %v785_v51 = vsel %vm63_vm0, %v784_v50, -inf  ;;  %v2462_v50 = vld [vmem:[%s3294_s8 + $0x18] sm:$0xff]  }
 0xa23   :  { %786 = vmax.xlane.f32.xlu1 %v785_v51  ;;  %2322 = vmatpush3.bf16.msra.mxu0 %v2462_v50  ;;  %v2463_v51 = vld [vmem:[%s3294_s8 + $0x20] sm:$0xff]  }
 0xa24   :  { %2323 = vmatprep.subr.bf16.mxu0 %v2585_v17 }
 0xa27   :  { %2324 = vmatpush3.bf16.msra.mxu0 %v2463_v51 }
 0xa28   :  { %2325 = vmatprep.subr.bf16.mxu0 %v2585_v17 }
 0xa2b   :  { %2326 = vmatpush3.bf16.msra.mxu0 %v2464_v9 }
 0xa2c   :  { %2327 = vmatprep.subr.bf16.mxu0 %v2585_v17 }
 0xa2f   :  { %2328 = vmatpush3.bf16.msra.mxu0 %v2465_v52 }
 0xa30   :  { %2329 = vmatprep.subr.bf16.mxu0 %v2585_v17 }
 0xa33   :  { %2330 = vmatpush3.bf16.msra.mxu0 %v2466_v53 }
 0xa34   :  { %2367 = vmatprep.subr.bf16.mxu0 %v2585_v17 }
 0xab0   :  { %v787_v2 = vpop.xlane.xlu1 %786 }
 0xab1   :  { %v788_v3 = vmax.f32 %v787_v2, 1e-05 }
 0xab3   :  { %2521 = vrcp.f32 %v788_v3  ;;  %v878_v18 = vmul.f32 0.007874016, %v788_v3 }
 0xabd   :  { %v2522_v6 = vpop.eup %2521 }
 0xabe   :  { %v790_v10 = vmul.f32 127.0, %v2522_v6 }
 0xac0   :  { %v791_v11 = vmul.f32 %v790_v10, %v775_v5 }
 0xac2   :  { %v2417_v13 = vround.rtne.f32 %v791_v11 }
 0xac4   :  { %v793_v16 = vpack.c.bf16 %v2417_v13, %v2417_v13 }
 0xac6   :  { %2120 = vmatmul.mubr.msk.bf16.vlgmr.msra.gmra.mrb[8].mxu1 %vm63_vm0, %v793_v16 }
 0xac7   :  { %2343 = vmatprep.mubr.msk.bf16.mxu1 %vm2586_vm1, %v2585_v17  ;;  %2336 = vmatpush3.bf16.msra.mxu1 %v2467_v35 }
 0xac8   :  { %2337 = vmatprep.subr.bf16.mxu1 %v2585_v17 }
 0xacb   :  { %2338 = vmatpush3.bf16.msra.mxu1 %v2468_v36 }
 0xacc   :  { %2339 = vmatprep.subr.bf16.mxu1 %v2585_v17 }
 0xb99   :  { %v871_v20 = vpop.f32.mrb[8].mxu1 }
 0xb9a   :  { %v879_v21 = vmul.f32 %v878_v18, %v871_v20  ;;  %v873_v22 = vpop.f32.mrb[9].mxu1 }
 0xb9b   :  { %v880_v23 = vmul.f32 %v878_v18, %v873_v22  ;;  %v875_v24 = vpop.f32.mrb[10].mxu1 }
 0xb9c   :  { %v881_v25 = vmax.f32 %v879_v21, 0.0  ;;  %v876_v27 = vpop.f32.mrb[11].mxu1 }
 0xb9e   :  { %v882_v29 = vmul.f32 %v881_v25, %v881_v25  ;;  %v2987_v25 = vld [vmem:[%s3295_s9 + $0x8] sm:$0xff] }
 0xba0   :  { %v883_v31 = vmul.f32 %v882_v29, %v880_v23 }
 0xba2   :  { %v884_v32 = vmul.f32 %v883_v31, %v883_v31 }
 0xba4   :  { %885 = vadd.xlane.f32.xlu0 %v884_v32 }
 0xc31   :  { %v886_v38 = vpop.xlane.xlu0 %885 }
 0xc32   :  { %v888_v40 = vmul.f32 0.0078125, %v886_v38  ;;  %v2469_v38 = vld [vmem:[%s3291_s5 + $0x30] sm:$0xff]  }
 0xc33   :  { %2340 = vmatpush3.bf16.msra.mxu1 %v2469_v38 }
 0xc34   :  { %v889_v41 = vadd.f32 1e-05, %v888_v40  ;;  %2341 = vmatprep.subr.bf16.mxu1 %v2585_v17  ;;  %v2470_v40 = vld [vmem:[%s3291_s5 + $0x38] sm:$0xff]   ;;  %s2080_s5 = sshll.u32 %s2600_s17, 4  ;;  %s2081_s5 = int_to_ptr.vmem [resolvable:$true] %s2080_s5 }
 0xc35   :  { %p2566_p1 = scmp.lt.s32.totalorder %s2081_s5, %s2081_s5 }
 0xc36   :  { %2523 = vrsqrt.f32 %v889_v41 }
 0xc37   :  { %2342 = vmatpush3.bf16.msra.mxu1 %v2470_v40 }
 0xc40   :  { %v2524_v46 = vpop.eup %2523 }
 0xc41   :  { %v891_v49 = vmul.f32 %v2524_v46, %v883_v31 }
 0xc43   :  { %v896_v0 = vmul.f32 %v895_v44, %v891_v49 }
 0xc45   :  { %v913_v5 = vand.u32 2147483647, %v896_v0 }
 0xc47   :  { %914 = vmax.xlane.f32.xlu1 %v913_v5 }
 0xcd4   :  { %v915_v54 = vpop.xlane.xlu1 %914 }
 0xcd5   :  { %v916_v55 = vmax.f32 %v915_v54, 1e-05 }
 0xcd7   :  { %2525 = vrcp.f32 %v916_v55  ;;  %v1010_v3 = vmul.f32 0.007874016, %v916_v55 }
 0xce1   :  { %v2526_v57 = vpop.eup %2525 }
 0xce2   :  { %v918_v60 = vmul.f32 127.0, %v2526_v57 }
 0xce4   :  { %v919_v61 = vmul.f32 %v918_v60, %v896_v0 }
 0xce6   :  { %v2418_v63 = vround.rtne.f32 %v919_v61 }
 0xce8   :  { %v921_v2 = vpack.c.bf16 %v2418_v63, %v2418_v63 }
 0xcea   :  { %2332 = vmatmul.mubr.bf16.vlgmr.msra.gmra.mrb[8].mxu0 %v921_v2 }
 0xceb   :  { %2375 = vmatprep.mubr.msk.bf16.mxu0 %vm2586_vm1, %v2585_v17 }
 0xdbd   :  { %v1004_v6 = vpop.f32.mrb[8].mxu0 }
 0xdbe   :  { %v1011_v10 = vmul.f32 %v1010_v3, %v1004_v6  ;;  %v2333_v11 = vpop.f32.mrb[9].mxu0 }
 0xdbf   :  { %v1007_v13 = vpop.f32.mrb[10].mxu0 }
 0xdc0   :  { %v2979_v16 = vadd.f32 %v1011_v10, %v2900_v34  ;;  %v2334_v18 = vpop.f32.mrb[11].mxu0  ;;  %v1026_v34 = vrot.slane %v2987_v25, %v2678_v8 }
 0xdc2   :  { %v1015_v20 = vmul.f32 %v2979_v16, %v2979_v16 }
 0xdc4   :  { %v1016_v21 = vsel %vm63_vm0, %v1015_v20, 0.0 }
 0xdc5   :  { %1017 = vadd.xlane.f32.xlu0 %v1016_v21 }
 0xe52   :  { %v1018_v22 = vpop.xlane.xlu0 %1017 }
 0xe53   :  { %v1019_v23 = vmul.f32 0.015625, %v1018_v22 }
 0xe55   :  { %v1020_v24 = vadd.f32 1e-05, %v1019_v23 }
 0xe57   :  { %2527 = vrsqrt.f32 %v1020_v24 }
 0xe61   :  { %v2528_v27 = vpop.eup %2527 }
 0xe62   :  { %v1022_v29 = vmul.f32 %v2528_v27, %v2979_v16 }
 0xe64   :  { %v1027_v31 = vmul.f32 %v1026_v34, %v1022_v29 }
 0xe66   :  { %v1037_v32 = vand.u32 2147483647, %v1027_v31 }
 0xe68   :  { %v1038_v33 = vsel %vm63_vm0, %v1037_v32, -inf }
 0xe69   :  { %1039 = vmax.xlane.f32.xlu1 %v1038_v33 }
 0xef6   :  { %v1040_v41 = vpop.xlane.xlu1 %1039 }
 0xef7   :  { %v1041_v44 = vmax.f32 %v1040_v41, 1e-05 }
 0xef9   :  { %2529 = vrcp.f32 %v1041_v44  ;;  %v1114_v51 = vmul.f32 0.007874016, %v1041_v44 }
 0xf03   :  { %v2530_v46 = vpop.eup %2529 }
 0xf04   :  { %v1043_v49 = vmul.f32 127.0, %v2530_v46 }
 0xf06   :  { %v1044_v0 = vmul.f32 %v1043_v49, %v1027_v31 }
 0xf08   :  { %v2419_v5 = vround.rtne.f32 %v1044_v0 }
 0xf0a   :  { %v1046_v50 = vpack.c.bf16 %v2419_v5, %v2419_v5 }
 0xf0c   :  { %2344 = vmatmul.mubr.msk.bf16.vlgmr.msra.gmra.mrb[12].mxu1 %vm63_vm0, %v1046_v50 }
 0xfdf   :  { %v1108_v9 = vpop.f32.mrb[12].mxu1 }
 0xfe0   :  { %v3009_v52 = vmul.f32 %v1114_v51, %v1108_v9  ;;  %v2345_v53 = vpop.f32.mrb[13].mxu1 }
 0xfe1   :  { %v1111_v54 = vpop.f32.mrb[14].mxu1 }
 0xfe2   :  { %1166 = vrot.lane.b32.xlu1 %v3009_v52, %s2589_s16  ;;  %1117 = vrot.lane.b32.xlu0 %v3009_v52, %s2588_s15  ;;  %v2346_v55 = vpop.f32.mrb[15].mxu1  ;;  %v1180_v20 = vmul.f32 %v3009_v52, %v2757_v47  ;;  %v1154_v27 = vmul.f32 %v3009_v52, %v2786_v59 }
 0xfe6   :  { %1172 = vrot.lane.b32.xlu1 %v3009_v52, %s2587_s14 }
0x1054   :  { %v1167_v57 = vpop.permute.xlu1 %1166  ;;  %v3017_v60 = vpop.permute.xlu0 %1117 }
0x1055   :  { %1174 = vrot.lane.b32.xlu1 %v3017_v60, %s2587_s14  ;;  %1168 = vrot.lane.b32.xlu0 %v3017_v60, %s2589_s16  ;;  %v1181_v21 = vmul.f32 %v3017_v60, %v2761_v48 }
0x1058   :  { %v1173_v61 = vpop.permute.xlu1 %1172 }
0x1059   :  { %v1178_v63 = vsel %vm198_vm2, %v1167_v57, %v1173_v61  ;;  %1120 = vrot.lane.b32.xlu1 %v3009_v52, %s2591_s23 }
0x105a   :  { %v1182_v2 = vmul.f32 %v1178_v63, %v2735_v39 }
0x105c   :  { %1186 = vrot.lane.b32.xlu0 %v1182_v2, %s2590_s19 }
0x105d   :  { %1123 = vrot.lane.b32.xlu1 %v3009_v52, %s2592_s24 }
0x1061   :  { %1138 = vrot.lane.b32.xlu1 %v3009_v52, %s2593_s3 }
0x1065   :  { %1140 = vrot.lane.b32.xlu1 %v3017_v60, %s2593_s3 }
0x10c7   :  { %v1175_v3 = vpop.permute.xlu1 %1174  ;;  %v1169_v6 = vpop.permute.xlu0 %1168 }
0x10c8   :  { %v1179_v10 = vsel %vm198_vm2, %v1169_v6, %v1175_v3 }
0x10c9   :  { %v1183_v11 = vmul.f32 %v1179_v10, %v2752_v43 }
0x10cb   :  { %v1121_v13 = vpop.permute.xlu1 %1120  ;;  %1188 = vrot.lane.b32.xlu0 %v1183_v11, %s2590_s19 }
0x10cc   :  { %1130 = vrot.lane.b32.xlu1 %v1121_v13, %s2594_s27  ;;  %v1156_v59 = vmul.f32 %v1121_v13, %v2813_v15 }
0x10ce   :  { %v1187_v18 = vpop.permute.xlu0 %1186 }
0x10cf   :  { %v1124_v39 = vpop.permute.xlu1 %1123  ;;  %1126 = vrot.lane.b32.xlu0 %v3009_v52, %s2594_s27  ;;  %v1192_v43 = vadd.f32 %v1187_v18, %v1180_v20 }
0x10d0   :  { %1132 = vrot.lane.b32.xlu1 %v1124_v39, %s2594_s27  ;;  %v1157_v50 = vmul.f32 %v1124_v39, %v2837_v28 }
0x10d3   :  { %1128 = vrot.lane.b32.xlu0 %v3017_v60, %s2594_s27  ;;  %v1139_v24 = vpop.permute.xlu1 %1138 }
0x10d7   :  { %1142 = vrot.lane.b32.xlu0 %v1121_v13, %s2593_s3  ;;  %v1141_v31 = vpop.permute.xlu1 %1140 }
0x10db   :  { %1195 = vrot.lane.b32.xlu0 %v1192_v43, %s2590_s19 }
0x10df   :  { %1144 = vrot.lane.b32.xlu0 %v1124_v39, %s2593_s3 }
0x113d   :  { %v1189_v22 = vpop.permute.xlu0 %1188 }
0x113e   :  { %v3050_v23 = vadd.f32 %v1189_v22, %v1181_v21  ;;  %v1131_v48 = vpop.permute.xlu1 %1130 }
0x1140   :  { %1286 = vrot.lane.b32.xlu1 %v3050_v23, %s2590_s19 }
0x1141   :  { %v1127_v34 = vpop.permute.xlu0 %1126 }
0x1142   :  { %v1150_v47 = vsel %vm198_vm2, %v1127_v34, %v1139_v24 }
0x1143   :  { %v1158_v29 = vmul.f32 %v1150_v47, %v2781_v58  ;;  %v1155_v58 = vmul.f32 %v3017_v60, %v2808_v14 }
0x1145   :  { %v1162_v32 = vadd.f32 %v1158_v29, %v1154_v27  ;;  %v1129_v33 = vpop.permute.xlu0 %1128 }
0x1146   :  { %v1151_v35 = vsel %vm198_vm2, %v1129_v33, %v1141_v31 }
0x1147   :  { %2349 = vmatprep.mubr.msk.f32.mxu1 %vm259_vm3, %v1162_v32  ;;  %v1159_v40 = vmul.f32 %v1151_v35, %v2796_v4 }
0x1149   :  { %v1143_v36 = vpop.permute.xlu0 %1142  ;;  %v1163_v46 = vadd.f32 %v1159_v40, %v1155_v58 }
0x114a   :  { %v1152_v38 = vsel %vm198_vm2, %v1131_v48, %v1143_v36 }
0x114b   :  { %v1160_v41 = vmul.f32 %v1152_v38, %v2802_v12  ;;  %v1133_v12 = vpop.permute.xlu1 %1132 }
0x114d   :  { %v3063_v44 = vpop.permute.xlu0 %1195  ;;  %v1164_v49 = vadd.f32 %v1160_v41, %v1156_v59 }
0x114e   :  { %2347 = vmatprep.subr.msk.mxu1 %vm259_vm3, %v3063_v44 }
0x114f   :  { %2348 = vmatpush3.xpose.msk.msra.mxu1 %vm259_vm3, %v3063_v44 }
0x1151   :  { %v1145_v4 = vpop.permute.xlu0 %1144 }
0x1152   :  { %2350 = vmatmul.mubr.msk.f32.vlgmr.msra.gmra.mrb[16].mxu1 %vm259_vm3, %v1163_v46  ;;  %v1153_v0 = vsel %vm198_vm2, %v1133_v12, %v1145_v4 }
0x1153   :  { %2354 = vmatprep.mubr.msk.f32.mxu1 %vm259_vm3, %v1164_v49  ;;  %v1161_v14 = vmul.f32 %v1153_v0, %v2831_v26 }
0x1155   :  { %v1165_v15 = vadd.f32 %v1161_v14, %v1157_v50 }
0x11b2   :  { %v1287_v5 = vpop.permute.xlu1 %1286 }
0x11b3   :  { %2352 = vmatprep.subr.msk.mxu1 %vm259_vm3, %v1287_v5 }
0x11b4   :  { %2353 = vmatpush3.xpose.msk.msra.mxu1 %vm259_vm3, %v1287_v5 }
0x11b7   :  { %2355 = vmatmul.mubr.msk.f32.vlgmr.msra.gmra.mrb[18].mxu1 %vm259_vm3, %v1165_v15 }
0x1225   :  { %v2351_v51 = vpop.f32.mrb[16].mxu1 }
0x1226   :  { %v1372_v9 = vadd.f32 %v2351_v51, %v2846_v37  ;;  %v1277_v53 = vpop.f32.mrb[17].mxu1 }
0x1227   :  { %v1371_v54 = vadd.f32 %v1277_v53, %v2846_v37 }
0x1228   :  { %v1378_v55 = vsel %vm198_vm2, %v1372_v9, -inf }
0x1229   :  { %1379 = vmax.xlane.f32.xlu1 %v1378_v55  ;;  %v1375_v26 = vsel %vm198_vm2, %v1371_v54, -inf }
0x122a   :  { %1376 = vmax.xlane.f32.xlu0 %v1375_v26 }
0x128a   :  { %v2356_v28 = vpop.f32.mrb[18].mxu1 }
0x128b   :  { %v1362_v57 = vpop.f32.mrb[19].mxu1  ;;  %v1374_v63 = vadd.f32 %v2356_v28, %v2846_v37 }
0x128c   :  { %v1373_v61 = vadd.f32 %v1362_v57, %v2846_v37 }
0x128d   :  { %v1384_v3 = vsel %vm198_vm2, %v1374_v63, -inf }
0x128e   :  { %v1381_v2 = vsel %vm198_vm2, %v1373_v61, -inf }
0x128f   :  { %1382 = vmax.xlane.f32.xlu0 %v1381_v2 }
0x1293   :  { %1385 = vmax.xlane.f32.xlu0 %v1384_v3  ;;  %v1613_v3 = vrot.slane %v2987_v25, %v672_v62  ;;  %v2473_v62 = vld [vmem:[%s3292_s6 + $0x30] sm:$0xff]  }
0x12b6   :  { %v1380_v6 = vpop.xlane.xlu1 %1379 }
0x12b7   :  { %v1388_v10 = vsub.f32 %v1372_v9, %v1380_v6  ;;  %v1377_v11 = vpop.xlane.xlu0 %1376 }
0x12b8   :  { %v1387_v13 = vsub.f32 %v1371_v54, %v1377_v11 }
0x12b9   :  { %v1393_v39 = vmul.f32 1.442695, %v1388_v10 }
0x12ba   :  { %v1391_v18 = vmul.f32 1.442695, %v1387_v13 }
0x12bb   :  { %2531 = vpow2.f32 %v1393_v39 }
0x12bc   :  { %2533 = vpow2.f32 %v1391_v18  ;;  %v2471_v18 = vld [vmem:[%s3292_s6 + $0x20] sm:$0xff]  }
0x12bd   :  { %2368 = vmatpush3.bf16.msra.mxu0 %v2471_v18 }
0x12be   :  { %2369 = vmatprep.subr.bf16.mxu0 %v2585_v17 }
0x12c5   :  { %v2532_v20 = vpop.eup %2531 }
0x12c6   :  { %v2534_v43 = vpop.eup %2533  ;;  %v1402_v21 = vsel %vm198_vm2, %v2532_v20, 0.0 }
0x12c7   :  { %1403 = vadd.xlane.f32.xlu0 %v1402_v21  ;;  %v1399_v37 = vsel %vm198_vm2, %v2534_v43, 0.0 }
0x12c8   :  { %1400 = vadd.xlane.f32.xlu1 %v1399_v37 }
0x131c   :  { %v1383_v22 = vpop.xlane.xlu0 %1382 }
0x131d   :  { %v1389_v24 = vsub.f32 %v1373_v61, %v1383_v22 }
0x131f   :  { %v1395_v34 = vmul.f32 1.442695, %v1389_v24 }
0x1320   :  { %v1386_v47 = vpop.xlane.xlu0 %1385 }
0x1321   :  { %2535 = vpow2.f32 %v1395_v34  ;;  %v1390_v27 = vsub.f32 %v1374_v63, %v1386_v47 }
0x1323   :  { %v1397_v29 = vmul.f32 1.442695, %v1390_v27 }
0x1325   :  { %2537 = vpow2.f32 %v1397_v29 }
0x132b   :  { %v2536_v31 = vpop.eup %2535 }
0x132c   :  { %v1405_v32 = vsel %vm198_vm2, %v2536_v31, 0.0 }
0x132d   :  { %1406 = vadd.xlane.f32.xlu1 %v1405_v32 }
0x132f   :  { %v2538_v33 = vpop.eup %2537 }
0x1330   :  { %v1408_v48 = vsel %vm198_vm2, %v2538_v33, 0.0 }
0x1331   :  { %1409 = vadd.xlane.f32.xlu0 %v1408_v48 }
0x133e   :  { %1419 = vrot.lane.b32.xlu1 %v3009_v52, %s2596_s1 }
0x1347   :  { %1503 = vrot.lane.b32.xlu0 %v3017_v60, %s2596_s1 }
0x1354   :  { %v1404_v40 = vpop.xlane.xlu0 %1403 }
0x1355   :  { %v1401_v35 = vpop.xlane.xlu1 %1400 }
0x1356   :  { %2539 = vrcp.f32 %v1401_v35 }
0x1357   :  { %2541 = vrcp.f32 %v1404_v40 }
0x1360   :  { %v2540_v36 = vpop.eup %2539 }
0x1361   :  { %v1415_v38 = vmul.f32 %v2540_v36, %v2534_v43  ;;  %v2542_v58 = vpop.eup %2541  ;;  %v2474_v43 = vld [vmem:[%s3292_s6 + $0x38] sm:$0xff]  }
0x1362   :  { %v1416_v49 = vmul.f32 %v2542_v58, %v2532_v20  ;;  %v2472_v20 = vld [vmem:[%s3292_s6 + $0x28] sm:$0xff]  }
0x1363   :  { %2359 = vmatprep.mubr.msk.f32.mxu1 %vm198_vm2, %v1415_v38  ;;  %2370 = vmatpush3.bf16.msra.mxu0 %v2472_v20 }
0x1364   :  { %2371 = vmatprep.subr.bf16.mxu0 %v2585_v17 }
0x1367   :  { %2372 = vmatpush3.bf16.msra.mxu0 %v2473_v62  ;;  %v2487_v62 = vld [vmem:[%s3294_s8 + $0x40] sm:$0xff]  }
0x1368   :  { %2373 = vmatprep.subr.bf16.mxu0 %v2585_v17 }
0x136b   :  { %2374 = vmatpush3.bf16.msra.mxu0 %v2474_v43  ;;  %v2488_v43 = vld [vmem:[%s3294_s8 + $0x48] sm:$0xff]  }
0x136c   :  { %2379 = vmatprep.subr.bf16.mxu0 %v2585_v17 }
0x13ba   :  { %v1407_v41 = vpop.xlane.xlu1 %1406 }
0x13bb   :  { %2543 = vrcp.f32 %v1407_v41 }
0x13be   :  { %v1420_v59 = vpop.permute.xlu1 %1419  ;;  %v1410_v46 = vpop.xlane.xlu0 %1409 }
0x13bf   :  { %2545 = vrcp.f32 %v1410_v46  ;;  %2357 = vmatprep.subr.mxu1 %v1420_v59  ;;  %v1715_v46 = vrot.slane %v2987_v25, %v773_v45  ;;  %v2480_v45 = vld [vmem:[%s3293_s7 + $0x54] ss:$8 sps:$4 sm:$0xff]  }
0x13c0   :  { %2358 = vmatpush3.msra.mxu1 %v1420_v59 }
0x13c1   :  { %2360 = vmatmul.mubr.msk.f32.vlgmr.msra.gmra.mrb[20].mxu1 %vm198_vm2, %v1416_v49 }
0x13c2   :  { %v1504_v60 = vpop.permute.xlu0 %1503 }
0x13c3   :  { %2362 = vmatprep.subr.mxu1 %v1504_v60 }
0x13c4   :  { %2363 = vmatpush3.msra.mxu1 %v1504_v60 }
0x13c5   :  { %v2544_v4 = vpop.eup %2543 }
0x13c6   :  { %v1417_v12 = vmul.f32 %v2544_v4, %v2536_v31 }
0x13c8   :  { %2364 = vmatprep.mubr.msk.f32.mxu1 %vm198_vm2, %v1417_v12 }
0x13c9   :  { %v2546_v0 = vpop.eup %2545 }
0x13ca   :  { %v1418_v14 = vmul.f32 %v2546_v0, %v2538_v33  ;;  %v2477_v0 = vld [vmem:[%s3293_s7 + $0x44] ss:$8 sps:$4 sm:$0xff]  }
0x13cb   :  { %1779 = vmatprep.subr.bf16.mxu1 %v2477_v0 }
0x13cc   :  { %2365 = vmatmul.mubr.msk.f32.vlgmr.msra.gmra.mrb[22].mxu1 %vm198_vm2, %v1418_v14  ;;  %v2475_v14 = vld [vmem:[%s3293_s7 + $0x40] ss:$8 sps:$4 sm:$0xff]  }
0x13cd   :  { %1811 = vmatprep.mubr.bf16.mxu1 %v2599_v1  ;;  %1780 = vmatpush1.bf16.msra.mxu1 %v2475_v14 }
0x13ce   :  { %1781 = vmatprep.subr.bf16.mxu1 %v2480_v45  ;;  %v1973_v45 = vld [vmem:[%s3296_s10 + $0x18] sm:$0xff] }
0x1494   :  { %v2361_v5 = vpop.f32.mrb[20].mxu1 }
0x1495   :  { %1588 = vrot.lane.b32.xlu1 %v2361_v5, %s2597_s2  ;;  %v1494_v50 = vpop.f32.mrb[21].mxu1  ;;  %v2478_v5 = vld [vmem:[%s3293_s7 + $0x50] ss:$8 sps:$4 sm:$0xff]  }
0x1496   :  { %1782 = vmatpush1.bf16.msra.mxu1 %v2478_v5 }
0x149f   :  { %v2366_v15 = vpop.f32.mrb[22].mxu1 }
0x14a0   :  { %1596 = vrot.lane.b32.xlu0 %v2366_v15, %s2598_s30  ;;  %v1578_v51 = vpop.f32.mrb[23].mxu1  ;;  %v2481_v15 = vld [vmem:[%s3293_s7 + $0x60] ss:$8 sps:$4 sm:$0xff]  }
0x14a1   :  { %1592 = vrot.lane.b32.xlu1 %v1578_v51, %s2596_s1  ;;  %v2486_v51 = vld [vmem:[%s3293_s7 + $0x74] ss:$8 sps:$4 sm:$0xff]  }
0x1507   :  { %v1589_v9 = vpop.permute.xlu1 %1588 }
0x1508   :  { %v1599_v53 = vsel %vm259_vm3, %v1494_v50, %v1589_v9  ;;  %v2483_v50 = vld [vmem:[%s3293_s7 + $0x64] ss:$8 sps:$4 sm:$0xff]   ;;  %v2484_v9 = vld [vmem:[%s3293_s7 + $0x70] ss:$8 sps:$4 sm:$0xff]   ;;  %s2561_s7 = scalar_lea.vmem %s2081_s5, 256 }
0x1509   :  { %1783 = vmatprep.subr.bf16.mxu1 %v2483_v50  ;;  %v1970_v50 = vld [vmem:[%s3296_s10] sm:$0xff]  ;;  %p2562_p0 = scmp.ne.s32.totalorder %s2081_s5, %s2561_s7  ;;  %p2567_p2 = scmp.lt.s32.totalorder %s2561_s7, %s2561_s7 }
0x150a   :  { %1784 = vmatpush1.bf16.msra.mxu1 %v2481_v15 }
0x150b   :  { %1785 = vmatprep.subr.bf16.mxu1 %v2486_v51  ;;  %v1975_v51 = vld [vmem:[%s3296_s10 + $0x28] sm:$0xff]  ;;  %p2568_p3 = por %p2567_p2, %p2566_p1 }
0x150d   :  { %p2569_p4 = pnand %p2568_p3, %p2562_p0 }
0x150e   :  { %1786 = vmatpush1.bf16.msra.mxu1 %v2484_v9  ;;  %v1977_v9 = vld [vmem:[%s3296_s10 + $0x38] sm:$0xff] }
0x1512   :  { %v1597_v55 = vpop.permute.xlu0 %1596 }
0x1513   :  { %v1593_v54 = vpop.permute.xlu1 %1592 }
0x1514   :  { %v1600_v26 = vsel %vm658_vm5, %v1599_v53, %v1593_v54 }
0x1515   :  { %v1601_v28 = vsel %vm660_vm6, %v1600_v26, %v1597_v55 }
0x1516   :  { %v1602_v1 = vmul.f32 %v1601_v28, %v1601_v28 }
0x1518   :  { %v1603_v57 = vsel %vm63_vm0, %v1602_v1, 0.0 }
0x1519   :  { %1604 = vadd.xlane.f32.xlu1 %v1603_v57 }
0x15a6   :  { %v1605_v61 = vpop.xlane.xlu1 %1604 }
0x15a7   :  { %v1606_v63 = vmul.f32 0.015625, %v1605_v61 }
0x15a9   :  { %v1607_v2 = vadd.f32 1e-05, %v1606_v63 }
0x15ab   :  { %2547 = vrsqrt.f32 %v1607_v2 }
0x15b5   :  { %v2548_v6 = vpop.eup %2547 }
0x15b6   :  { %v1609_v10 = vmul.f32 %v2548_v6, %v1601_v28 }
0x15b8   :  { %v1614_v11 = vmul.f32 %v1613_v3, %v1609_v10 }
0x15ba   :  { %v1624_v13 = vand.u32 2147483647, %v1614_v11 }
0x15bc   :  { %v1625_v39 = vsel %vm63_vm0, %v1624_v13, -inf }
0x15bd   :  { %1626 = vmax.xlane.f32.xlu0 %v1625_v39 }
0x164a   :  { %v1627_v21 = vpop.xlane.xlu0 %1626 }
0x164b   :  { %v1628_v37 = vmax.f32 %v1627_v21, 1e-05  ;;  %v2489_v21 = vld [vmem:[%s3294_s8 + $0x50] sm:$0xff]  }
0x164d   :  { %2549 = vrcp.f32 %v1628_v37  ;;  %v1701_v29 = vmul.f32 0.007874016, %v1628_v37 }
0x1657   :  { %v2550_v22 = vpop.eup %2549 }
0x1658   :  { %v1630_v24 = vmul.f32 127.0, %v2550_v22 }
0x165a   :  { %v1631_v34 = vmul.f32 %v1630_v24, %v1614_v11 }
0x165c   :  { %v2420_v47 = vround.rtne.f32 %v1631_v34  ;;  %v1836_v34 = vrot.slane %v2987_v25, %v894_v42  ;;  %v2492_v42 = vld [vmem:[%s3294_s8 + $0x68] sm:$0xff]   ;;  %v2493_v25 = vld [vmem:[%s3294_s8 + $0x70] sm:$0xff]  }
0x165e   :  { %v1633_v27 = vpack.c.bf16 %v2420_v47, %v2420_v47 }
0x1660   :  { %2376 = vmatmul.mubr.msk.bf16.vlgmr.msra.gmra.mrb[12].mxu0 %vm63_vm0, %v1633_v27 }
0x1661   :  { %2395 = vmatprep.mubr.msk.bf16.mxu0 %vm2586_vm1, %v2585_v17  ;;  %2380 = vmatpush3.bf16.msra.mxu0 %v2487_v62 }
0x1662   :  { %2381 = vmatprep.subr.bf16.mxu0 %v2585_v17 }
0x1665   :  { %2382 = vmatpush3.bf16.msra.mxu0 %v2488_v43 }
0x1666   :  { %2383 = vmatprep.subr.bf16.mxu0 %v2585_v17 }
0x1669   :  { %2384 = vmatpush3.bf16.msra.mxu0 %v2489_v21 }
0x166a   :  { %2385 = vmatprep.subr.bf16.mxu0 %v2585_v17 }
0x1733   :  { %v1695_v31 = vpop.f32.mrb[12].mxu0 }
0x1734   :  { %v1702_v32 = vmul.f32 %v1701_v29, %v1695_v31  ;;  %v2377_v33 = vpop.f32.mrb[13].mxu0 }
0x1735   :  { %v1698_v48 = vpop.f32.mrb[14].mxu0 }
0x1736   :  { %v3132_v35 = vadd.f32 %v1702_v32, %v2979_v16  ;;  %v2378_v36 = vpop.f32.mrb[15].mxu0  ;;  %v2490_v32 = vld [vmem:[%s3294_s8 + $0x58] sm:$0xff]  }
0x1737   :  { %2386 = vmatpush3.bf16.msra.mxu0 %v2490_v32 }
0x1738   :  { %v1704_v38 = vmul.f32 %v3132_v35, %v3132_v35  ;;  %2387 = vmatprep.subr.bf16.mxu0 %v2585_v17 }
0x173a   :  { %v1705_v40 = vsel %vm63_vm0, %v1704_v38, 0.0 }
0x173b   :  { %1706 = vadd.xlane.f32.xlu0 %v1705_v40  ;;  %2388 = vmatpush3.bf16.msra.mxu0 %v2491_v7 }
0x173c   :  { %2389 = vmatprep.subr.bf16.mxu0 %v2585_v17 }
0x173f   :  { %2390 = vmatpush3.bf16.msra.mxu0 %v2492_v42 }
0x1740   :  { %2391 = vmatprep.subr.bf16.mxu0 %v2585_v17 }
0x1743   :  { %2392 = vmatpush3.bf16.msra.mxu0 %v2493_v25 }
0x1744   :  { %2393 = vmatprep.subr.bf16.mxu0 %v2585_v17 }
0x17c8   :  { %v1707_v41 = vpop.xlane.xlu0 %1706 }
0x17c9   :  { %v1708_v58 = vmul.f32 0.015625, %v1707_v41 }
0x17cb   :  { %v1709_v59 = vadd.f32 1e-05, %v1708_v58 }
0x17cd   :  { %2551 = vrsqrt.f32 %v1709_v59 }
0x17d7   :  { %v2552_v49 = vpop.eup %2551 }
0x17d8   :  { %v1711_v60 = vmul.f32 %v2552_v49, %v3132_v35 }
0x17da   :  { %v1716_v16 = vmul.f32 %v1715_v46, %v1711_v60 }
0x17dc   :  { %v1726_v4 = vand.u32 2147483647, %v1716_v16 }
0x17de   :  { %v1727_v12 = vsel %vm63_vm0, %v1726_v4, -inf }
0x17df   :  { %1728 = vmax.xlane.f32.xlu1 %v1727_v12 }
0x186c   :  { %v1729_v53 = vpop.xlane.xlu1 %1728 }
0x186d   :  { %v1730_v54 = vmax.f32 %v1729_v53, 1e-05  ;;  %v2403_v53 = vpack.c.bf16 %v1977_v9, %v1975_v51 }
0x186f   :  { %2553 = vrcp.f32 %v1730_v54  ;;  %v1820_v61 = vmul.f32 0.007874016, %v1730_v54  ;;  %v1974_v54 = vld [vmem:[%s3296_s10 + $0x20] sm:$0xff] }
0x1879   :  { %v2554_v55 = vpop.eup %2553 }
0x187a   :  { %v1732_v26 = vmul.f32 127.0, %v2554_v55  ;;  %v1976_v55 = vld [vmem:[%s3296_s10 + $0x30] sm:$0xff] }
0x187c   :  { %v1733_v28 = vmul.f32 %v1732_v26, %v1716_v16  ;;  %v2405_v26 = vpack.c.bf16 %v1976_v55, %v1974_v54 }
0x187e   :  { %v2421_v1 = vround.rtne.f32 %v1733_v28  ;;  %v1979_v28 = vld [vmem:[%s3296_s10 + $0x48] sm:$0xff] }
0x1880   :  { %v1735_v57 = vpack.c.bf16 %v2421_v1, %v2421_v1  ;;  %v1981_v1 = vld [vmem:[%s3296_s10 + $0x58] sm:$0xff] }
0x1882   :  { %2182 = vmatmul.mubr.msk.bf16.vlgmr.msra.gmra.mrb[24].mxu1 %vm63_vm0, %v1735_v57  ;;  %v2407_v57 = vpack.c.bf16 %v1981_v1, %v1979_v28 }
0x1883   :  { %2053 = vmatprep.mubr.f32.mxu1 %v2585_v17 }
0x1955   :  { %v1813_v63 = vpop.f32.mrb[24].mxu1 }
0x1956   :  { %v1821_v2 = vmul.f32 %v1820_v61, %v1813_v63  ;;  %v1815_v3 = vpop.f32.mrb[25].mxu1  ;;  %v1980_v63 = vld [vmem:[%s3296_s10 + $0x50] sm:$0xff] }
0x1957   :  { %v1822_v6 = vmul.f32 %v1820_v61, %v1815_v3  ;;  %v1817_v10 = vpop.f32.mrb[26].mxu1  ;;  %v1978_v61 = vld [vmem:[%s3296_s10 + $0x40] sm:$0xff]  ;;  %v1985_v3 = vld [vmem:[%s3296_s10 + $0x78] sm:$0xff] }
0x1958   :  { %v1823_v11 = vmax.f32 %v1821_v2, 0.0  ;;  %v1818_v13 = vpop.f32.mrb[27].mxu1  ;;  %v2409_v2 = vpack.c.bf16 %v1980_v63, %v1978_v61  ;;  %v1982_v10 = vld [vmem:[%s3296_s10 + $0x60] sm:$0xff] }
0x195a   :  { %v1824_v39 = vmul.f32 %v1823_v11, %v1823_v11  ;;  %v1984_v11 = vld [vmem:[%s3296_s10 + $0x70] sm:$0xff] }
0x195b   :  { %v2413_v13 = vpack.c.bf16 %v1984_v11, %v1982_v10 }
0x195c   :  { %v1825_v18 = vmul.f32 %v1824_v39, %v1822_v6 }
0x195e   :  { %v1826_v20 = vmul.f32 %v1825_v18, %v1825_v18 }
0x1960   :  { %1827 = vadd.xlane.f32.xlu0 %v1826_v20 }
0x19ed   :  { %v1828_v37 = vpop.xlane.xlu0 %1827 }
0x19ee   :  { %v1829_v22 = vmul.f32 0.0078125, %v1828_v37 }
0x19f0   :  { %v1830_v24 = vadd.f32 1e-05, %v1829_v22 }
0x19f2   :  { %2555 = vrsqrt.f32 %v1830_v24 }
0x19fc   :  { %v2556_v47 = vpop.eup %2555 }
0x19fd   :  { %v1832_v27 = vmul.f32 %v2556_v47, %v1825_v18  ;;  %v2207_v47 = vld [vmem:[%s3295_s9 + $0x10] sm:$0xff] }
0x19ff   :  { %v1837_v29 = vmul.f32 %v1836_v34, %v1832_v27  ;;  %v1968_v27 = vrot.slane %v2207_v47, %v2678_v8 }
0x1a01   :  { %v1855_v31 = vand.u32 2147483647, %v1837_v29 }
0x1a03   :  { %1856 = vmax.xlane.f32.xlu1 %v1855_v31 }
0x1a14   :  { %1199 = vrot.lane.b32.xlu1 %v3050_v23, %s2592_s24 }
0x1a18   :  { %2062 = vrot.lane.b32.xlu1 %v2711_v30, %s2590_s19  ;;  %v2494_v30 = vld [vmem:[%s3294_s8 + $0x78] sm:$0xff]  }
0x1a19   :  { %2394 = vmatpush3.bf16.msra.mxu0 %v2494_v30 }
0x1a90   :  { %v1857_v23 = vpop.xlane.xlu1 %1856 }
0x1a91   :  { %v1858_v33 = vmax.f32 %v1857_v23, 1e-05 }
0x1a93   :  { %2557 = vrcp.f32 %v1858_v33  ;;  %v1952_v17 = vmul.f32 0.007874016, %v1858_v33 }
0x1a94   :  { %v1200_v48 = vpop.permute.xlu1 %1199 }
0x1a95   :  { %v1202_v36 = vsel %vm259_vm3, %v3063_v44, %v1200_v48  ;;  %v1971_v44 = vld [vmem:[%s3296_s10 + $0x8] sm:$0xff] }
0x1a96   :  { %2066 = vrot.lane.b32.xlu1 %v1202_v36, %s2590_s19  ;;  %v2399_v5 = vpack.c.bf16 %v1973_v45, %v1971_v44 }
0x1a98   :  { %2400 = vmatprep.subr.bf16.mxu1 %v2399_v5  ;;  %v2063_v20 = vpop.permute.xlu1 %2062 }
0x1a9d   :  { %v2558_v38 = vpop.eup %2557 }
0x1a9e   :  { %v1860_v40 = vmul.f32 127.0, %v2558_v38 }
0x1aa0   :  { %v1861_v41 = vmul.f32 %v1860_v40, %v1837_v29 }
0x1aa2   :  { %v2422_v58 = vround.rtne.f32 %v1861_v41 }
0x1aa4   :  { %v1863_v59 = vpack.c.bf16 %v2422_v58, %v2422_v58 }
0x1aa6   :  { %2396 = vmatmul.mubr.bf16.vlgmr.msra.gmra.mrb[16].mxu0 %v1863_v59 }
0x1b08   :  { %v2067_v37 = vpop.permute.xlu1 %2066 }
0x1b79   :  { %v1946_v46 = vpop.f32.mrb[16].mxu0 }
0x1b7a   :  { %v1953_v49 = vmul.f32 %v1952_v17, %v1946_v46  ;;  %v2397_v60 = vpop.f32.mrb[17].mxu0 }
0x1b7b   :  { %v1949_v16 = vpop.f32.mrb[18].mxu0 }
0x1b7c   :  { %v1954_v4 = vadd.f32 %v1953_v49, %v3132_v35  ;;  %v2398_v12 = vpop.f32.mrb[19].mxu0  ;;  %v1972_v35 = vld [vmem:[%s3296_s10 + $0x10] sm:$0xff] }
0x1b7d   :  { %v2401_v15 = vpack.c.bf16 %v1972_v35, %v1970_v50 }
0x1b7e   :  { %v1957_v0 = vmul.f32 %v1954_v4, %v1954_v4 }
0x1b7f   :  { %2402 = vmatpush1.bf16.msra.mxu1 %v2401_v15 }
0x1b80   :  { %v1958_v14 = vsel %vm63_vm0, %v1957_v0, 0.0  ;;  %2404 = vmatprep.subr.bf16.mxu1 %v2403_v53 }
0x1b81   :  { %1959 = vadd.xlane.f32.xlu0 %v1958_v14 }
0x1b83   :  { %2406 = vmatpush1.bf16.msra.mxu1 %v2405_v26 }
0x1b84   :  { %2408 = vmatprep.subr.bf16.mxu1 %v2407_v57 }
0x1b87   :  { %2410 = vmatpush1.bf16.msra.mxu1 %v2409_v2 }
0x1b97   :  { %256 = vrot.lane.b32.xlu0 %v2774_v56, %s2592_s24  ;;  %v1983_v56 = vld [vmem:[%s3296_s10 + $0x68] sm:$0xff] }
0x1b98   :  { %v2411_v6 = vpack.c.bf16 %v1985_v3, %v1983_v56 }
0x1b9a   :  { %2412 = vmatprep.subr.bf16.mxu1 %v2411_v6 }
0x1b9b   :  { %2414 = vmatpush1.bf16.msra.mxu1 %v2413_v13 }
0x1c0e   :  { %v1960_v39 = vpop.xlane.xlu0 %1959 }
0x1c0f   :  { %v1961_v18 = vmul.f32 0.015625, %v1960_v39 }
0x1c11   :  { %v1962_v62 = vadd.f32 1e-05, %v1961_v18 }
0x1c12   :  { %v257_v43 = vpop.permute.xlu0 %256 }
0x1c13   :  { %2559 = vrsqrt.f32 %v1962_v62  ;;  %v260_v21 = vsel %vm259_vm3, %v2817_v19, %v257_v43 }
0x1c14   :  { %v2069_v22 = vsel %vm658_vm5, %v260_v21, %v2063_v20 }
0x1c15   :  { %v2070_v24 = vsel %vm63_vm0, %v2069_v22, %v2067_v37 }
0x1c16   :  { %v2072_v34 = vsel %vm2071_vm7, %v2070_v24, %v3009_v52 }
0x1c17   :  { %2073 = vst [vmem:[%s3298_s12] sm:$0xff] %v2072_v34 }
0x1c1d   :  { %v2560_v29 = vpop.eup %2559 }
0x1c1e   :  { %v1964_v31 = vmul.f32 %v2560_v29, %v1954_v4 }
0x1c20   :  { %v1969_v19 = vmul.f32 %v1968_v27, %v1964_v31 }
0x1c22   :  { %2208 = vmatmul.mubr.msk.f32.vlgmr.msra.gmra.mrb[28].mxu1 %vm63_vm0, %v1969_v19 }
0x1cf5   :  { %v2055_v32 = vpop.f32.mrb[28].mxu1 }
0x1cf6   :  { %2060 = vst [vmem:[#allocation2] sm:$0xff] %v2055_v32  ;;  %v2057_v52 = vpop.f32.mrb[29].mxu1 }
0x1cf7   :  { %2061 = vst [vmem:[#allocation2 + $0x8] sm:$0xff] %v2057_v52 }
0x1cf8   :  { %2572 = shalt.err (!%p2569_p4)
}
0x1cf9   :  { %s2573_s14 = scalar_lea.hbm %s3297_s11, 256 }
0x1cfa   :  { %p2574_p5 = scmp.ne.s32.totalorder %s3297_s11, %s2573_s14  ;;  %p2577_p6 = scmp.lt.u32.totalorder %s2573_s14, %s3297_s11 }
0x1cfc   :  { %p2579_p7 = pnand %p2577_p6, %p2574_p5 }
0x1cfe   :  { %2582 = shalt.err (!%p2579_p7)
}
0x1cff   :  { %2083 = dma.vmem_to_hbm [thread:$0]  %s2081_s5, 256, %s3297_s11, [#allocation3]  }
0x1d00   :  { %2583 = dma.done.wait [#allocation3], 256  }
0x1d01   :  { %2584 = vsyncadd [#allocation3], 4294967040 }
0x1d02   :  { %2091 = vsyncpa [#allocation3], 1 }

</bundles_post_ra>
